<compile_context>
chip_gen: v7x
topology: tpu7x:2x2x1
jax: 0.10.0
libtpu: 0.0.40
codegen_flags: <defaults>
</compile_context>

<pallas_src>
import functools
import math

import jax
import jax.numpy as jnp
from jax.experimental import pallas as pl
from jax.experimental.pallas import tpu as pltpu

EPS = 1e-5
LANE = 128


# ---------------------------------------------------------------------------
# helpers
# ---------------------------------------------------------------------------
def _round_up(n, m):
    return ((n + m - 1) // m) * m


def _pad_axis(a, axis, new_size):
    pad = new_size - a.shape[axis]
    if pad == 0:
        return a
    widths = [(0, 0)] * a.ndim
    widths[axis] = (0, pad)
    return jnp.pad(a, widths)


def _vmem_capacity_bytes():
    try:
        return int(pltpu.get_tpu_info().vmem_capacity_bytes)
    except Exception:
        return 64 * 1024 * 1024          # conservative (v7x per-TC)


def _mxu_row_target():
    # v5e MXU is 128-wide; v6e/v7x are 256-wide.
    try:
        kind = jax.devices()[0].device_kind.lower()
    except Exception:
        return 256
    return 128 if ("v5 lite" in kind or "v5e" in kind) else 256


def _layer_vmem_bytes(tb, L, Dp, Fp, emit_attn):
    """Rough per-grid-step VMEM estimate (weights single-buffered)."""
    f32, bf16 = 4, 2
    rows = tb * L
    io = 2 * rows * Dp * (f32 + f32)                     # x in + y out, 2 buffers
    attn = 2 * rows * L * bf16 if emit_attn else 0       # bf16 attn out, 2 buffers
    wts = (4 * Dp * Dp + 2 * Dp * Fp) * bf16             # single-buffered weights
    vecs = (11 * Dp + Fp) * f32
    live = rows * (8 * Dp + 2 * Fp) * f32 + 3 * tb * L * L * f32
    return io + attn + wts + vecs + live


def _pick_batch_block(B, L, Dp, Fp, emit_attn, budget, row_target):
    divs = [d for d in range(1, B + 1) if B % d == 0]
    # Prefer grid >= 2: shards the batch over both v7x TensorCores and keeps
    # input/output pipelining overlap alive.
    pref = [d for d in divs if B // d >= 2] or divs
    fitting = [d for d in pref if _layer_vmem_bytes(d, L, Dp, Fp, emit_attn) <= budget]
    if not fitting:
        fitting = [pref[0]]
    for d in fitting:                      # smallest tb reaching the MXU row target
        if d * L >= row_target:
            return d
    return fitting[-1]                     # else largest tb that fits the budget


# ---------------------------------------------------------------------------
# kernels
# ---------------------------------------------------------------------------
def _layernorm(h, gamma, beta, d_true):
    # one-pass stats (var = E[x^2] - E[x]^2); correct with zero-padded lanes
    # because sums over padded lanes contribute 0 and we divide by d_true.
    inv_d = 1.0 / float(d_true)
    s = h.sum(axis=-1, keepdims=True)
    ss = (h * h).sum(axis=-1, keepdims=True)
    mu = s * inv_d
    var = ss * inv_d - mu * mu
    inv = jax.lax.rsqrt(var + EPS)
    return (h - mu) * inv * gamma + beta


def _encoder_layer_kernel(d_true, apply_final_norm, emit_attn,
                          x_ref,
                          wq_ref, bq_ref, wk_ref, bk_ref, wv_ref, bv_ref,
                          wo_ref, bo_ref, g1_ref, be1_ref,
                          w1_ref, b1_ref, w2_ref, b2_ref, g2_ref, be2_ref,
                          gn_ref, bn_ref,
                          y_ref, attn_ref=None):
    x_in = x_ref[...]                                   # (TB, L, Dp), bf16 or f32
    tb, L, Dp = x_in.shape
    xb = x_in.reshape(tb * L, Dp).astype(jnp.bfloat16)  # MXU operand
    x2 = x_in.reshape(tb * L, Dp).astype(jnp.float32)   # residual path

    # ---- QKV projections (bf16 MXU operands, f32 accumulation) ----
    q = jnp.dot(xb, wq_ref[...], preferred_element_type=jnp.float32) + bq_ref[...]
    k = jnp.dot(xb, wk_ref[...], preferred_element_type=jnp.float32) + bk_ref[...]
    v = jnp.dot(xb, wv_ref[...], preferred_element_type=jnp.float32) + bv_ref[...]

    # fold 1/sqrt(d_true) into q (O(L*D) scale instead of O(L^2))
    scale = 1.0 / math.sqrt(float(d_true))
    qb = (q * scale).reshape(tb, L, Dp).astype(jnp.bfloat16)
    kb = k.reshape(tb, L, Dp).astype(jnp.bfloat16)
    vb = v.reshape(tb, L, Dp).astype(jnp.bfloat16)

    # ---- scores / softmax / context ----
    # TODO(synk): flash-style online-softmax K-block tiling for long L.
    scores = jnp.einsum('bqd,bkd->bqk', qb, kb,
                        preferred_element_type=jnp.float32)     # (TB, L, L)
    m = scores.max(axis=-1, keepdims=True)
    e = jnp.exp(scores - m)
    denom = e.sum(axis=-1, keepdims=True)
    # exact division when the attention map is returned downstream,
    # approx EUP reciprocal otherwise.
    a = e * pl.reciprocal(denom, approx=not emit_attn)
    if emit_attn:
        attn_ref[...] = a.astype(attn_ref.dtype)
    ctx = jnp.einsum('bqk,bkd->bqd', a.astype(jnp.bfloat16), vb,
                     preferred_element_type=jnp.float32)        # (TB, L, Dp)

    # ---- output projection + residual + LN1 ----
    ctx2 = ctx.reshape(tb * L, Dp).astype(jnp.bfloat16)
    out = jnp.dot(ctx2, wo_ref[...], preferred_element_type=jnp.float32) + bo_ref[...]
    h = x2 + out
    y1 = _layernorm(h, g1_ref[...], be1_ref[...], d_true)

    # ---- FFN (Conv1d k=1 == matmul over D) + residual + LN2 ----
    h1 = jnp.dot(y1.astype(jnp.bfloat16), w1_ref[...],
                 preferred_element_type=jnp.float32) + b1_ref[...]
    h1 = jnp.maximum(h1, 0.0)
    o2 = jnp.dot(h1.astype(jnp.bfloat16), w2_ref[...],
                 preferred_element_type=jnp.float32) + b2_ref[...]
    y2 = _layernorm(y1 + o2, g2_ref[...], be2_ref[...], d_true)

    if apply_final_norm:                                        # fused final norm
        y2 = _layernorm(y2, gn_ref[...], bn_ref[...], d_true)

    y_ref[...] = y2.reshape(tb, L, Dp).astype(y_ref.dtype)


def _layernorm_kernel(x_ref, g_ref, b_ref, o_ref):
    # standalone final norm, only used when there are no attention layers
    x = x_ref[0].astype(jnp.float32)
    o_ref[0] = _layernorm(x, g_ref[...], b_ref[...], x.shape[-1]).astype(o_ref.dtype)


# ---------------------------------------------------------------------------
# pallas_call wrappers
# ---------------------------------------------------------------------------
def _encoder_layer(xp, lp, gn, bn, *, d_true, tb, apply_final_norm, emit_attn,
                   out_dtype, attn_dtype, vmem_limit):
    B, L, Dp = xp.shape
    Fp = lp["w1"].shape[1]

    x_spec = pl.BlockSpec((tb, L, Dp), lambda b: (b, 0, 0))
    y_spec = pl.BlockSpec((tb, L, Dp), lambda b: (b, 0, 0))

    y_shape = jax.ShapeDtypeStruct((B, L, Dp), out_dtype)
    if emit_attn:
        out_shape = (y_shape, jax.ShapeDtypeStruct((B, L, L), attn_dtype))
        out_specs = (y_spec, pl.BlockSpec((tb, L, L), lambda b: (b, 0, 0)))
    else:
        out_shape = y_shape
        out_specs = y_spec

    kernel = functools.partial(_encoder_layer_kernel, d_true,
                               apply_final_norm, emit_attn)

    def run(weight_mode):
        def cspec(shape):
            if weight_mode is None:
                return pl.BlockSpec(shape, lambda b: (0, 0))
            return pl.BlockSpec(shape, lambda b: (0, 0), pipeline_mode=weight_mode)

        mat_dd = cspec((Dp, Dp))
        mat_df = cspec((Dp, Fp))
        mat_fd = cspec((Fp, Dp))
        vec_d = cspec((1, Dp))
        vec_f = cspec((1, Fp))

        in_specs = [x_spec,
                    mat_dd, vec_d, mat_dd, vec_d, mat_dd, vec_d,   # wq/bq wk/bk wv/bv
                    mat_dd, vec_d, vec_d, vec_d,                   # wo/bo ln1_g/ln1_b
                    mat_df, vec_f, mat_fd, vec_d, vec_d, vec_d,    # w1/b1 w2/b2 ln2_g/b
                    vec_d, vec_d]                                  # final-norm g/b

        return pl.pallas_call(
            kernel,
            out_shape=out_shape,
            grid=(B // tb,),
            in_specs=in_specs,
            out_specs=out_specs,
            compiler_params=pltpu.CompilerParams(
                dimension_semantics=("parallel",),        # shard batch over TCs
                vmem_limit_bytes=vmem_limit),
        )(xp, lp["wq"], lp["bq"], lp["wk"], lp["bk"], lp["wv"], lp["bv"],
          lp["wo"], lp["bo"], lp["ln1_g"], lp["ln1_b"],
          lp["w1"], lp["b1"], lp["w2"], lp["b2"], lp["ln2_g"], lp["ln2_b"],
          gn, bn)

    try:
        # Grid-invariant weights/biases: single VMEM buffer (no double buffer).
        res = run(pl.Buffered(1))
    except Exception:
        # TODO(synk): fallback if this JAX build rejects Buffered(1) inputs.
        res = run(None)

    if emit_attn:
        return res
    return res, None


def _final_norm(x, gamma, beta):
    B, L, D = x.shape
    return pl.pallas_call(
        _layernorm_kernel,
        out_shape=jax.ShapeDtypeStruct((B, L, D), x.dtype),
        grid=(B,),
        in_specs=[pl.BlockSpec((1, L, D), lambda b: (b, 0, 0)),
                  pl.BlockSpec((1, D), lambda b: (0, 0)),
                  pl.BlockSpec((1, D), lambda b: (0, 0))],
        out_specs=pl.BlockSpec((1, L, D), lambda b: (b, 0, 0)),
        compiler_params=pltpu.CompilerParams(dimension_semantics=("parallel",)),
    )(x, gamma, beta)


def _prepare_layer(lp, Dp, Fp):
    """Zero-pad to lane-dense (multiple-of-128) feature dims; weights -> bf16."""
    pad2 = lambda w, r, c: _pad_axis(_pad_axis(w, 0, r), 1, c)
    return dict(
        wq=pad2(lp["wq"], Dp, Dp).astype(jnp.bfloat16), bq=_pad_axis(lp["bq"], 1, Dp),
        wk=pad2(lp["wk"], Dp, Dp).astype(jnp.bfloat16), bk=_pad_axis(lp["bk"], 1, Dp),
        wv=pad2(lp["wv"], Dp, Dp).astype(jnp.bfloat16), bv=_pad_axis(lp["bv"], 1, Dp),
        wo=pad2(lp["wo"], Dp, Dp).astype(jnp.bfloat16), bo=_pad_axis(lp["bo"], 1, Dp),
        ln1_g=_pad_axis(lp["ln1_g"], 1, Dp), ln1_b=_pad_axis(lp["ln1_b"], 1, Dp),
        w1=pad2(lp["w1"], Dp, Fp).astype(jnp.bfloat16), b1=_pad_axis(lp["b1"], 1, Fp),
        w2=pad2(lp["w2"], Fp, Dp).astype(jnp.bfloat16), b2=_pad_axis(lp["b2"], 1, Dp),
        ln2_g=_pad_axis(lp["ln2_g"], 1, Dp), ln2_b=_pad_axis(lp["ln2_b"], 1, Dp),
    )


def encoder_forward(x, params, attn_mask=None, tau=None, delta=None,
                    collect_attn=True):
    """Mirrors Encoder.forward (conv_layers=None path): loop over attn layers,
    collect per-layer attention maps, apply the optional final norm."""
    # TODO(synk): attn_mask / tau / delta accepted for signature parity; the
    # container does not define the attention variants that consume them, so
    # unmasked full attention (eval mode, no dropout) is used per layer.
    del attn_mask, tau, delta

    B, L, D = x.shape
    layers = params["layers"]
    has_norm = params.get("norm_g") is not None

    if not layers:
        if has_norm:
            x = _final_norm(x, params["norm_g"], params["norm_b"])
        return x, []

    Dp = _round_up(D, LANE)
    Fp_max = max(_round_up(lp["w1"].shape[1], LANE) for lp in layers)

    cap = _vmem_capacity_bytes()
    vmem_limit = int(cap * 0.85)          # headroom for compiler scratch / spills
    budget = int(cap * 0.70)              # budget for choosing the batch block
    tb = _pick_batch_block(B, L, Dp, Fp_max, collect_attn, budget,
                           _mxu_row_target())

    xp = _pad_axis(x, 2, Dp)
    if has_norm:
        gn = _pad_axis(params["norm_g"], 1, Dp)
        bn = _pad_axis(params["norm_b"], 1, Dp)
    else:
        gn = jnp.zeros((1, Dp), jnp.float32)
        bn = jnp.zeros((1, Dp), jnp.float32)

    attns = []
    n = len(layers)
    for i, lp in enumerate(layers):
        Fp = _round_up(lp["w1"].shape[1], LANE)
        lpp = _prepare_layer(lp, Dp, Fp)
        last = (i == n - 1)
        # carry inter-layer activations in bf16; last layer back to x.dtype
        out_dtype = x.dtype if last else jnp.bfloat16
        xp, a = _encoder_layer(
            xp, lpp, gn, bn, d_true=D, tb=tb,
            apply_final_norm=(has_norm and last),
            emit_attn=collect_attn,
            out_dtype=out_dtype, attn_dtype=jnp.bfloat16,
            vmem_limit=vmem_limit)
        attns.append(a[:, None, :, :] if a is not None else None)
        # TODO(synk): cross-pallas_call prefetch of the next layer's weights.

    return xp[:, :, :D], attns


# ---------------------------------------------------------------------------
# deterministic parameters + pure-JAX reference
# ---------------------------------------------------------------------------
def make_params(key, num_layers, d_model, d_ff):
    layers = []
    for i in range(num_layers):
        k = jax.random.fold_in(key, i)
        ks = jax.random.split(k, 6)
        s = 0.05
        layers.append(dict(
            wq=s * jax.random.normal(ks[0], (d_model, d_model), jnp.float32),
            bq=jnp.zeros((1, d_model), jnp.float32),
            wk=s * jax.random.normal(ks[1], (d_model, d_model), jnp.float32),
            bk=jnp.zeros((1, d_model), jnp.float32),
            wv=s * jax.random.normal(ks[2], (d_model, d_model), jnp.float32),
            bv=jnp.zeros((1, d_model), jnp.float32),
            wo=s * jax.random.normal(ks[3], (d_model, d_model), jnp.float32),
            bo=jnp.zeros((1, d_model), jnp.float32),
            ln1_g=jnp.ones((1, d_model), jnp.float32),
            ln1_b=jnp.zeros((1, d_model), jnp.float32),
            w1=s * jax.random.normal(ks[4], (d_model, d_ff), jnp.float32),
            b1=jnp.zeros((1, d_ff), jnp.float32),
            w2=s * jax.random.normal(ks[5], (d_ff, d_model), jnp.float32),
            b2=jnp.zeros((1, d_model), jnp.float32),
            ln2_g=jnp.ones((1, d_model), jnp.float32),
            ln2_b=jnp.zeros((1, d_model), jnp.float32),
        ))
    return dict(layers=layers,
                norm_g=jnp.ones((1, d_model), jnp.float32),
                norm_b=jnp.zeros((1, d_model), jnp.float32))


def _ln_ref(h, g, b):
    mu = h.mean(-1, keepdims=True)
    var = ((h - mu) ** 2).mean(-1, keepdims=True)
    return (h - mu) / jnp.sqrt(var + EPS) * g + b


def _reference_forward(x, params):
    attns = []
    for lp in params["layers"]:
        q = x @ lp["wq"] + lp["bq"]
        k = x @ lp["wk"] + lp["bk"]
        v = x @ lp["wv"] + lp["bv"]
        s = jnp.einsum('bqd,bkd->bqk', q, k) / jnp.sqrt(jnp.float32(x.shape[-1]))
        a = jax.nn.softmax(s, axis=-1)
        ctx = jnp.einsum('bqk,bkd->bqd', a, v)
        h = _ln_ref(x + (ctx @ lp["wo"] + lp["bo"]), lp["ln1_g"], lp["ln1_b"])
        f = jnp.maximum(h @ lp["w1"] + lp["b1"], 0.0) @ lp["w2"] + lp["b2"]
        x = _ln_ref(h + f, lp["ln2_g"], lp["ln2_b"])
        attns.append(a[:, None, :, :])
    if params.get("norm_g") is not None:
        x = _ln_ref(x, params["norm_g"], params["norm_b"])
    return x, attns


if __name__ == "__main__":
    B, L, D, DFF, NLAYERS = 2, 8, 32, 64, 2
    key = jax.random.PRNGKey(0)
    kx, kp = jax.random.split(key)
    x = jax.random.normal(kx, (B, L, D), jnp.float32)   # layout: [B, L, D]
    params = make_params(kp, NLAYERS, D, DFF)

    y, attns = encoder_forward(x, params)
    jax.block_until_ready(y)
    for a in attns:
        jax.block_until_ready(a)

    assert y.shape == (B, L, D) and y.dtype == x.dtype
    assert len(attns) == NLAYERS and attns[0].shape == (B, 1, L, L)

    a0 = attns[0].astype(jnp.float32)
    # attention rows sum to ~1 (exact softmax division, bf16 storage)
    assert jnp.allclose(a0.sum(-1), 1.0, atol=1e-2)

    # pure-JAX f32 reference; kernel uses bf16 MXU operands and carries
    # inter-layer activations in bf16 -> loose tolerance
    y_ref, attns_ref = _reference_forward(x, params)
    err = float(jnp.abs(y - y_ref).max())
    assert err < 8e-2, err
    assert jnp.allclose(a0, attns_ref[0], atol=2e-2)
    assert bool(jnp.all(jnp.isfinite(y)))
    print("KERNEL_OK")
</pallas_src>

<mosaic_0001>
module attributes {stable_mosaic.version = 11 : i64} {
  func.func @_encoder_layer_kernel(%arg0: i32, %arg1: memref<1x8x128xf32, #tpu.memory_space<vmem>>, %arg2: memref<128x128xbf16, #tpu.memory_space<vmem>>, %arg3: memref<1x128xf32, #tpu.memory_space<vmem>>, %arg4: memref<128x128xbf16, #tpu.memory_space<vmem>>, %arg5: memref<1x128xf32, #tpu.memory_space<vmem>>, %arg6: memref<128x128xbf16, #tpu.memory_space<vmem>>, %arg7: memref<1x128xf32, #tpu.memory_space<vmem>>, %arg8: memref<128x128xbf16, #tpu.memory_space<vmem>>, %arg9: memref<1x128xf32, #tpu.memory_space<vmem>>, %arg10: memref<1x128xf32, #tpu.memory_space<vmem>>, %arg11: memref<1x128xf32, #tpu.memory_space<vmem>>, %arg12: memref<128x128xbf16, #tpu.memory_space<vmem>>, %arg13: memref<1x128xf32, #tpu.memory_space<vmem>>, %arg14: memref<128x128xbf16, #tpu.memory_space<vmem>>, %arg15: memref<1x128xf32, #tpu.memory_space<vmem>>, %arg16: memref<1x128xf32, #tpu.memory_space<vmem>>, %arg17: memref<1x128xf32, #tpu.memory_space<vmem>>, %arg18: memref<1x128xf32, #tpu.memory_space<vmem>>, %arg19: memref<1x128xf32, #tpu.memory_space<vmem>>, %arg20: memref<1x8x128xbf16, #tpu.memory_space<vmem>>, %arg21: memref<1x8x8xbf16, #tpu.memory_space<vmem>>) attributes {dimension_semantics = [#tpu.dimension_semantics<parallel>], iteration_bounds = array<i64: 2>, scalar_prefetch = 0 : i64, scratch_operands = 0 : i64, tpu.core_type = #tpu.core_type<tc>, window_params = [{transform_indices = @transform_0, window_bounds = array<i64: 1, 8, 128>}, {pipeline_mode = #tpu.pipeline_mode<synchronous>, transform_indices = @transform_1, window_bounds = array<i64: 128, 128>}, {pipeline_mode = #tpu.pipeline_mode<synchronous>, transform_indices = @transform_2, window_bounds = array<i64: 1, 128>}, {pipeline_mode = #tpu.pipeline_mode<synchronous>, transform_indices = @transform_3, window_bounds = array<i64: 128, 128>}, {pipeline_mode = #tpu.pipeline_mode<synchronous>, transform_indices = @transform_4, window_bounds = array<i64: 1, 128>}, {pipeline_mode = #tpu.pipeline_mode<synchronous>, transform_indices = @transform_5, window_bounds = array<i64: 128, 128>}, {pipeline_mode = #tpu.pipeline_mode<synchronous>, transform_indices = @transform_6, window_bounds = array<i64: 1, 128>}, {pipeline_mode = #tpu.pipeline_mode<synchronous>, transform_indices = @transform_7, window_bounds = array<i64: 128, 128>}, {pipeline_mode = #tpu.pipeline_mode<synchronous>, transform_indices = @transform_8, window_bounds = array<i64: 1, 128>}, {pipeline_mode = #tpu.pipeline_mode<synchronous>, transform_indices = @transform_9, window_bounds = array<i64: 1, 128>}, {pipeline_mode = #tpu.pipeline_mode<synchronous>, transform_indices = @transform_10, window_bounds = array<i64: 1, 128>}, {pipeline_mode = #tpu.pipeline_mode<synchronous>, transform_indices = @transform_11, window_bounds = array<i64: 128, 128>}, {pipeline_mode = #tpu.pipeline_mode<synchronous>, transform_indices = @transform_12, window_bounds = array<i64: 1, 128>}, {pipeline_mode = #tpu.pipeline_mode<synchronous>, transform_indices = @transform_13, window_bounds = array<i64: 128, 128>}, {pipeline_mode = #tpu.pipeline_mode<synchronous>, transform_indices = @transform_14, window_bounds = array<i64: 1, 128>}, {pipeline_mode = #tpu.pipeline_mode<synchronous>, transform_indices = @transform_15, window_bounds = array<i64: 1, 128>}, {pipeline_mode = #tpu.pipeline_mode<synchronous>, transform_indices = @transform_16, window_bounds = array<i64: 1, 128>}, {pipeline_mode = #tpu.pipeline_mode<synchronous>, transform_indices = @transform_17, window_bounds = array<i64: 1, 128>}, {pipeline_mode = #tpu.pipeline_mode<synchronous>, transform_indices = @transform_18, window_bounds = array<i64: 1, 128>}, {transform_indices = @transform_19, window_bounds = array<i64: 1, 8, 128>}, {transform_indices = @transform_20, window_bounds = array<i64: 1, 8, 8>}]} {
    %c0 = arith.constant 0 : index
    %c0_0 = arith.constant 0 : index
    %c0_1 = arith.constant 0 : index
    %0 = vector.load %arg1[%c0, %c0_0, %c0_1] : memref<1x8x128xf32, #tpu.memory_space<vmem>>, vector<1x8x128xf32>
    %1 = vector.shape_cast %0 : vector<1x8x128xf32> to vector<8x128xf32>
    %2 = arith.truncf %1 : vector<8x128xf32> to vector<8x128xbf16>
    %3 = vector.shape_cast %0 : vector<1x8x128xf32> to vector<8x128xf32>
    %c0_2 = arith.constant 0 : index
    %c0_3 = arith.constant 0 : index
    %4 = vector.load %arg2[%c0_2, %c0_3] : memref<128x128xbf16, #tpu.memory_space<vmem>>, vector<128x128xbf16>
    %cst = arith.constant dense<0.000000e+00> : vector<8x128xf32>
    %5 = tpu.matmul %2, %4, %cst {dimension_numbers = #tpu.dot_dimension_numbers<[1], [0], [0], [1], [0, 0, 1, 1], [], []>} : vector<8x128xbf16>, vector<128x128xbf16>, vector<8x128xf32> -> vector<8x128xf32>
    %c0_4 = arith.constant 0 : index
    %c0_5 = arith.constant 0 : index
    %6 = vector.load %arg3[%c0_4, %c0_5] : memref<1x128xf32, #tpu.memory_space<vmem>>, vector<1x128xf32>
    %7 = vector.broadcast %6 : vector<1x128xf32> to vector<8x128xf32>
    %8 = arith.addf %5, %7 : vector<8x128xf32>
    %c0_6 = arith.constant 0 : index
    %c0_7 = arith.constant 0 : index
    %9 = vector.load %arg4[%c0_6, %c0_7] : memref<128x128xbf16, #tpu.memory_space<vmem>>, vector<128x128xbf16>
    %cst_8 = arith.constant dense<0.000000e+00> : vector<8x128xf32>
    %10 = tpu.matmul %2, %9, %cst_8 {dimension_numbers = #tpu.dot_dimension_numbers<[1], [0], [0], [1], [0, 0, 1, 1], [], []>} : vector<8x128xbf16>, vector<128x128xbf16>, vector<8x128xf32> -> vector<8x128xf32>
    %c0_9 = arith.constant 0 : index
    %c0_10 = arith.constant 0 : index
    %11 = vector.load %arg5[%c0_9, %c0_10] : memref<1x128xf32, #tpu.memory_space<vmem>>, vector<1x128xf32>
    %12 = vector.broadcast %11 : vector<1x128xf32> to vector<8x128xf32>
    %13 = arith.addf %10, %12 : vector<8x128xf32>
    %c0_11 = arith.constant 0 : index
    %c0_12 = arith.constant 0 : index
    %14 = vector.load %arg6[%c0_11, %c0_12] : memref<128x128xbf16, #tpu.memory_space<vmem>>, vector<128x128xbf16>
    %cst_13 = arith.constant dense<0.000000e+00> : vector<8x128xf32>
    %15 = tpu.matmul %2, %14, %cst_13 {dimension_numbers = #tpu.dot_dimension_numbers<[1], [0], [0], [1], [0, 0, 1, 1], [], []>} : vector<8x128xbf16>, vector<128x128xbf16>, vector<8x128xf32> -> vector<8x128xf32>
    %c0_14 = arith.constant 0 : index
    %c0_15 = arith.constant 0 : index
    %16 = vector.load %arg7[%c0_14, %c0_15] : memref<1x128xf32, #tpu.memory_space<vmem>>, vector<1x128xf32>
    %17 = vector.broadcast %16 : vector<1x128xf32> to vector<8x128xf32>
    %18 = arith.addf %15, %17 : vector<8x128xf32>
    %cst_16 = arith.constant 0.176776692 : f32
    %19 = vector.broadcast %cst_16 : f32 to vector<8x128xf32>
    %20 = arith.mulf %8, %19 : vector<8x128xf32>
    %21 = vector.shape_cast %20 : vector<8x128xf32> to vector<1x8x128xf32>
    %22 = arith.truncf %21 : vector<1x8x128xf32> to vector<1x8x128xbf16>
    %23 = vector.shape_cast %13 : vector<8x128xf32> to vector<1x8x128xf32>
    %24 = arith.truncf %23 : vector<1x8x128xf32> to vector<1x8x128xbf16>
    %25 = vector.shape_cast %18 : vector<8x128xf32> to vector<1x8x128xf32>
    %26 = arith.truncf %25 : vector<1x8x128xf32> to vector<1x8x128xbf16>
    "tpu.trace_start"() <{level = 10 : i32, message = "bqd,bkd->bqk"}> : () -> ()
    %cst_17 = arith.constant dense<0.000000e+00> : vector<1x8x8xf32>
    %27 = tpu.matmul %22, %24, %cst_17 {dimension_numbers = #tpu.dot_dimension_numbers<[2], [2], [1], [1], [0, 0, 0, 1, 1, 1], [0], [0]>} : vector<1x8x128xbf16>, vector<1x8x128xbf16>, vector<1x8x8xf32> -> vector<1x8x8xf32>
    "tpu.trace_stop"() : () -> ()
    %cst_18 = arith.constant dense<0xFF800000> : vector<1x8xf32>
    %28 = vector.multi_reduction <maximumf>, %27, %cst_18 [2] : vector<1x8x8xf32> to vector<1x8xf32>
    %29 = vector.shape_cast %28 : vector<1x8xf32> to vector<1x8x1xf32>
    %30 = vector.broadcast %29 : vector<1x8x1xf32> to vector<1x8x8xf32>
    %31 = arith.subf %27, %30 : vector<1x8x8xf32>
    %32 = math.exp %31 : vector<1x8x8xf32>
    %cst_19 = arith.constant dense<0.000000e+00> : vector<1x8xf32>
    %33 = vector.multi_reduction <add>, %32, %cst_19 [2] : vector<1x8x8xf32> to vector<1x8xf32>
    %34 = vector.shape_cast %33 : vector<1x8xf32> to vector<1x8x1xf32>
    %35 = tpu.reciprocal %34 : vector<1x8x1xf32> -> vector<1x8x1xf32>
    %36 = vector.broadcast %35 : vector<1x8x1xf32> to vector<1x8x8xf32>
    %37 = arith.mulf %32, %36 : vector<1x8x8xf32>
    %38 = arith.truncf %37 : vector<1x8x8xf32> to vector<1x8x8xbf16>
    %c0_20 = arith.constant 0 : index
    %c0_21 = arith.constant 0 : index
    %c0_22 = arith.constant 0 : index
    %39 = vector.load %arg21[%c0_20, %c0_21, %c0_22] : memref<1x8x8xbf16, #tpu.memory_space<vmem>>, vector<1x8x8xbf16>
    tpu.vector_store %arg21[%c0_20, %c0_21, %c0_22], %38 {strides = array<i32>} : memref<1x8x8xbf16, #tpu.memory_space<vmem>>, vector<1x8x8xbf16>,
    %40 = arith.truncf %37 : vector<1x8x8xf32> to vector<1x8x8xbf16>
    "tpu.trace_start"() <{level = 10 : i32, message = "bqk,bkd->bqd"}> : () -> ()
    %cst_23 = arith.constant dense<0.000000e+00> : vector<1x8x128xf32>
    %41 = tpu.matmul %40, %26, %cst_23 {dimension_numbers = #tpu.dot_dimension_numbers<[2], [1], [1], [2], [0, 0, 0, 1, 1, 2], [0], [0]>} : vector<1x8x8xbf16>, vector<1x8x128xbf16>, vector<1x8x128xf32> -> vector<1x8x128xf32>
    "tpu.trace_stop"() : () -> ()
    %42 = vector.shape_cast %41 : vector<1x8x128xf32> to vector<8x128xf32>
    %43 = arith.truncf %42 : vector<8x128xf32> to vector<8x128xbf16>
    %c0_24 = arith.constant 0 : index
    %c0_25 = arith.constant 0 : index
    %44 = vector.load %arg8[%c0_24, %c0_25] : memref<128x128xbf16, #tpu.memory_space<vmem>>, vector<128x128xbf16>
    %cst_26 = arith.constant dense<0.000000e+00> : vector<8x128xf32>
    %45 = tpu.matmul %43, %44, %cst_26 {dimension_numbers = #tpu.dot_dimension_numbers<[1], [0], [0], [1], [0, 0, 1, 1], [], []>} : vector<8x128xbf16>, vector<128x128xbf16>, vector<8x128xf32> -> vector<8x128xf32>
    %c0_27 = arith.constant 0 : index
    %c0_28 = arith.constant 0 : index
    %46 = vector.load %arg9[%c0_27, %c0_28] : memref<1x128xf32, #tpu.memory_space<vmem>>, vector<1x128xf32>
    %47 = vector.broadcast %46 : vector<1x128xf32> to vector<8x128xf32>
    %48 = arith.addf %45, %47 : vector<8x128xf32>
    %49 = arith.addf %3, %48 : vector<8x128xf32>
    %c0_29 = arith.constant 0 : index
    %c0_30 = arith.constant 0 : index
    %50 = vector.load %arg10[%c0_29, %c0_30] : memref<1x128xf32, #tpu.memory_space<vmem>>, vector<1x128xf32>
    %c0_31 = arith.constant 0 : index
    %c0_32 = arith.constant 0 : index
    %51 = vector.load %arg11[%c0_31, %c0_32] : memref<1x128xf32, #tpu.memory_space<vmem>>, vector<1x128xf32>
    %cst_33 = arith.constant dense<0.000000e+00> : vector<8xf32>
    %52 = vector.multi_reduction <add>, %49, %cst_33 [1] : vector<8x128xf32> to vector<8xf32>
    %53 = vector.shape_cast %52 : vector<8xf32> to vector<8x1xf32>
    %54 = arith.mulf %49, %49 : vector<8x128xf32>
    %cst_34 = arith.constant dense<0.000000e+00> : vector<8xf32>
    %55 = vector.multi_reduction <add>, %54, %cst_34 [1] : vector<8x128xf32> to vector<8xf32>
    %56 = vector.shape_cast %55 : vector<8xf32> to vector<8x1xf32>
    %cst_35 = arith.constant 3.125000e-02 : f32
    %57 = vector.broadcast %cst_35 : f32 to vector<8x1xf32>
    %58 = arith.mulf %53, %57 : vector<8x1xf32>
    %cst_36 = arith.constant 3.125000e-02 : f32
    %59 = vector.broadcast %cst_36 : f32 to vector<8x1xf32>
    %60 = arith.mulf %56, %59 : vector<8x1xf32>
    %61 = arith.mulf %58, %58 : vector<8x1xf32>
    %62 = arith.subf %60, %61 : vector<8x1xf32>
    %cst_37 = arith.constant 9.99999974E-6 : f32
    %63 = vector.broadcast %cst_37 : f32 to vector<8x1xf32>
    %64 = arith.addf %62, %63 : vector<8x1xf32>
    %65 = math.rsqrt %64 : vector<8x1xf32>
    %66 = vector.broadcast %58 : vector<8x1xf32> to vector<8x128xf32>
    %67 = arith.subf %49, %66 : vector<8x128xf32>
    %68 = vector.broadcast %65 : vector<8x1xf32> to vector<8x128xf32>
    %69 = arith.mulf %67, %68 : vector<8x128xf32>
    %70 = vector.broadcast %50 : vector<1x128xf32> to vector<8x128xf32>
    %71 = arith.mulf %69, %70 : vector<8x128xf32>
    %72 = vector.broadcast %51 : vector<1x128xf32> to vector<8x128xf32>
    %73 = arith.addf %71, %72 : vector<8x128xf32>
    %74 = arith.truncf %73 : vector<8x128xf32> to vector<8x128xbf16>
    %c0_38 = arith.constant 0 : index
    %c0_39 = arith.constant 0 : index
    %75 = vector.load %arg12[%c0_38, %c0_39] : memref<128x128xbf16, #tpu.memory_space<vmem>>, vector<128x128xbf16>
    %cst_40 = arith.constant dense<0.000000e+00> : vector<8x128xf32>
    %76 = tpu.matmul %74, %75, %cst_40 {dimension_numbers = #tpu.dot_dimension_numbers<[1], [0], [0], [1], [0, 0, 1, 1], [], []>} : vector<8x128xbf16>, vector<128x128xbf16>, vector<8x128xf32> -> vector<8x128xf32>
    %c0_41 = arith.constant 0 : index
    %c0_42 = arith.constant 0 : index
    %77 = vector.load %arg13[%c0_41, %c0_42] : memref<1x128xf32, #tpu.memory_space<vmem>>, vector<1x128xf32>
    %78 = vector.broadcast %77 : vector<1x128xf32> to vector<8x128xf32>
    %79 = arith.addf %76, %78 : vector<8x128xf32>
    %cst_43 = arith.constant 0.000000e+00 : f32
    %80 = vector.broadcast %cst_43 : f32 to vector<8x128xf32>
    %81 = arith.maximumf %79, %80 : vector<8x128xf32>
    %82 = arith.truncf %81 : vector<8x128xf32> to vector<8x128xbf16>
    %c0_44 = arith.constant 0 : index
    %c0_45 = arith.constant 0 : index
    %83 = vector.load %arg14[%c0_44, %c0_45] : memref<128x128xbf16, #tpu.memory_space<vmem>>, vector<128x128xbf16>
    %cst_46 = arith.constant dense<0.000000e+00> : vector<8x128xf32>
    %84 = tpu.matmul %82, %83, %cst_46 {dimension_numbers = #tpu.dot_dimension_numbers<[1], [0], [0], [1], [0, 0, 1, 1], [], []>} : vector<8x128xbf16>, vector<128x128xbf16>, vector<8x128xf32> -> vector<8x128xf32>
    %c0_47 = arith.constant 0 : index
    %c0_48 = arith.constant 0 : index
    %85 = vector.load %arg15[%c0_47, %c0_48] : memref<1x128xf32, #tpu.memory_space<vmem>>, vector<1x128xf32>
    %86 = vector.broadcast %85 : vector<1x128xf32> to vector<8x128xf32>
    %87 = arith.addf %84, %86 : vector<8x128xf32>
    %88 = arith.addf %73, %87 : vector<8x128xf32>
    %c0_49 = arith.constant 0 : index
    %c0_50 = arith.constant 0 : index
    %89 = vector.load %arg16[%c0_49, %c0_50] : memref<1x128xf32, #tpu.memory_space<vmem>>, vector<1x128xf32>
    %c0_51 = arith.constant 0 : index
    %c0_52 = arith.constant 0 : index
    %90 = vector.load %arg17[%c0_51, %c0_52] : memref<1x128xf32, #tpu.memory_space<vmem>>, vector<1x128xf32>
    %cst_53 = arith.constant dense<0.000000e+00> : vector<8xf32>
    %91 = vector.multi_reduction <add>, %88, %cst_53 [1] : vector<8x128xf32> to vector<8xf32>
    %92 = vector.shape_cast %91 : vector<8xf32> to vector<8x1xf32>
    %93 = arith.mulf %88, %88 : vector<8x128xf32>
    %cst_54 = arith.constant dense<0.000000e+00> : vector<8xf32>
    %94 = vector.multi_reduction <add>, %93, %cst_54 [1] : vector<8x128xf32> to vector<8xf32>
    %95 = vector.shape_cast %94 : vector<8xf32> to vector<8x1xf32>
    %cst_55 = arith.constant 3.125000e-02 : f32
    %96 = vector.broadcast %cst_55 : f32 to vector<8x1xf32>
    %97 = arith.mulf %92, %96 : vector<8x1xf32>
    %cst_56 = arith.constant 3.125000e-02 : f32
    %98 = vector.broadcast %cst_56 : f32 to vector<8x1xf32>
    %99 = arith.mulf %95, %98 : vector<8x1xf32>
    %100 = arith.mulf %97, %97 : vector<8x1xf32>
    %101 = arith.subf %99, %100 : vector<8x1xf32>
    %cst_57 = arith.constant 9.99999974E-6 : f32
    %102 = vector.broadcast %cst_57 : f32 to vector<8x1xf32>
    %103 = arith.addf %101, %102 : vector<8x1xf32>
    %104 = math.rsqrt %103 : vector<8x1xf32>
    %105 = vector.broadcast %97 : vector<8x1xf32> to vector<8x128xf32>
    %106 = arith.subf %88, %105 : vector<8x128xf32>
    %107 = vector.broadcast %104 : vector<8x1xf32> to vector<8x128xf32>
    %108 = arith.mulf %106, %107 : vector<8x128xf32>
    %109 = vector.broadcast %89 : vector<1x128xf32> to vector<8x128xf32>
    %110 = arith.mulf %108, %109 : vector<8x128xf32>
    %111 = vector.broadcast %90 : vector<1x128xf32> to vector<8x128xf32>
    %112 = arith.addf %110, %111 : vector<8x128xf32>
    %113 = vector.shape_cast %112 : vector<8x128xf32> to vector<1x8x128xf32>
    %114 = arith.truncf %113 : vector<1x8x128xf32> to vector<1x8x128xbf16>
    %c0_58 = arith.constant 0 : index
    %c0_59 = arith.constant 0 : index
    %c0_60 = arith.constant 0 : index
    %115 = vector.load %arg20[%c0_58, %c0_59, %c0_60] : memref<1x8x128xbf16, #tpu.memory_space<vmem>>, vector<1x8x128xbf16>
    tpu.vector_store %arg20[%c0_58, %c0_59, %c0_60], %114 {strides = array<i32>} : memref<1x8x128xbf16, #tpu.memory_space<vmem>>, vector<1x8x128xbf16>,
    return
  }
  func.func @transform_0(%arg0: i32) -> (i32, i32, i32) {
    %c0_i32 = arith.constant 0 : i32
    %c0_i32_0 = arith.constant 0 : i32
    %c0_i32_1 = arith.constant 0 : i32
    return %arg0, %c0_i32, %c0_i32_0 : i32, i32, i32
  }
  func.func @transform_1(%arg0: i32) -> (i32, i32) {
    %c0_i32 = arith.constant 0 : i32
    %c0_i32_0 = arith.constant 0 : i32
    %c0_i32_1 = arith.constant 0 : i32
    return %c0_i32, %c0_i32_0 : i32, i32
  }
  func.func @transform_2(%arg0: i32) -> (i32, i32) {
    %c0_i32 = arith.constant 0 : i32
    %c0_i32_0 = arith.constant 0 : i32
    %c0_i32_1 = arith.constant 0 : i32
    return %c0_i32, %c0_i32_0 : i32, i32
  }
  func.func @transform_3(%arg0: i32) -> (i32, i32) {
    %c0_i32 = arith.constant 0 : i32
    %c0_i32_0 = arith.constant 0 : i32
    %c0_i32_1 = arith.constant 0 : i32
    return %c0_i32, %c0_i32_0 : i32, i32
  }
  func.func @transform_4(%arg0: i32) -> (i32, i32) {
    %c0_i32 = arith.constant 0 : i32
    %c0_i32_0 = arith.constant 0 : i32
    %c0_i32_1 = arith.constant 0 : i32
    return %c0_i32, %c0_i32_0 : i32, i32
  }
  func.func @transform_5(%arg0: i32) -> (i32, i32) {
    %c0_i32 = arith.constant 0 : i32
    %c0_i32_0 = arith.constant 0 : i32
    %c0_i32_1 = arith.constant 0 : i32
    return %c0_i32, %c0_i32_0 : i32, i32
  }
  func.func @transform_6(%arg0: i32) -> (i32, i32) {
    %c0_i32 = arith.constant 0 : i32
    %c0_i32_0 = arith.constant 0 : i32
    %c0_i32_1 = arith.constant 0 : i32
    return %c0_i32, %c0_i32_0 : i32, i32
  }
  func.func @transform_7(%arg0: i32) -> (i32, i32) {
    %c0_i32 = arith.constant 0 : i32
    %c0_i32_0 = arith.constant 0 : i32
    %c0_i32_1 = arith.constant 0 : i32
    return %c0_i32, %c0_i32_0 : i32, i32
  }
  func.func @transform_8(%arg0: i32) -> (i32, i32) {
    %c0_i32 = arith.constant 0 : i32
    %c0_i32_0 = arith.constant 0 : i32
    %c0_i32_1 = arith.constant 0 : i32
    return %c0_i32, %c0_i32_0 : i32, i32
  }
  func.func @transform_9(%arg0: i32) -> (i32, i32) {
    %c0_i32 = arith.constant 0 : i32
    %c0_i32_0 = arith.constant 0 : i32
    %c0_i32_1 = arith.constant 0 : i32
    return %c0_i32, %c0_i32_0 : i32, i32
  }
  func.func @transform_10(%arg0: i32) -> (i32, i32) {
    %c0_i32 = arith.constant 0 : i32
    %c0_i32_0 = arith.constant 0 : i32
    %c0_i32_1 = arith.constant 0 : i32
    return %c0_i32, %c0_i32_0 : i32, i32
  }
  func.func @transform_11(%arg0: i32) -> (i32, i32) {
    %c0_i32 = arith.constant 0 : i32
    %c0_i32_0 = arith.constant 0 : i32
    %c0_i32_1 = arith.constant 0 : i32
    return %c0_i32, %c0_i32_0 : i32, i32
  }
  func.func @transform_12(%arg0: i32) -> (i32, i32) {
    %c0_i32 = arith.constant 0 : i32
    %c0_i32_0 = arith.constant 0 : i32
    %c0_i32_1 = arith.constant 0 : i32
    return %c0_i32, %c0_i32_0 : i32, i32
  }
  func.func @transform_13(%arg0: i32) -> (i32, i32) {
    %c0_i32 = arith.constant 0 : i32
    %c0_i32_0 = arith.constant 0 : i32
    %c0_i32_1 = arith.constant 0 : i32
    return %c0_i32, %c0_i32_0 : i32, i32
  }
  func.func @transform_14(%arg0: i32) -> (i32, i32) {
    %c0_i32 = arith.constant 0 : i32
    %c0_i32_0 = arith.constant 0 : i32
    %c0_i32_1 = arith.constant 0 : i32
    return %c0_i32, %c0_i32_0 : i32, i32
  }
  func.func @transform_15(%arg0: i32) -> (i32, i32) {
    %c0_i32 = arith.constant 0 : i32
    %c0_i32_0 = arith.constant 0 : i32
    %c0_i32_1 = arith.constant 0 : i32
    return %c0_i32, %c0_i32_0 : i32, i32
  }
  func.func @transform_16(%arg0: i32) -> (i32, i32) {
    %c0_i32 = arith.constant 0 : i32
    %c0_i32_0 = arith.constant 0 : i32
    %c0_i32_1 = arith.constant 0 : i32
    return %c0_i32, %c0_i32_0 : i32, i32
  }
  func.func @transform_17(%arg0: i32) -> (i32, i32) {
    %c0_i32 = arith.constant 0 : i32
    %c0_i32_0 = arith.constant 0 : i32
    %c0_i32_1 = arith.constant 0 : i32
    return %c0_i32, %c0_i32_0 : i32, i32
  }
  func.func @transform_18(%arg0: i32) -> (i32, i32) {
    %c0_i32 = arith.constant 0 : i32
    %c0_i32_0 = arith.constant 0 : i32
    %c0_i32_1 = arith.constant 0 : i32
    return %c0_i32, %c0_i32_0 : i32, i32
  }
  func.func @transform_19(%arg0: i32) -> (i32, i32, i32) {
    %c0_i32 = arith.constant 0 : i32
    %c0_i32_0 = arith.constant 0 : i32
    %c0_i32_1 = arith.constant 0 : i32
    return %arg0, %c0_i32, %c0_i32_0 : i32, i32, i32
  }
  func.func @transform_20(%arg0: i32) -> (i32, i32, i32) {
    %c0_i32 = arith.constant 0 : i32
    %c0_i32_0 = arith.constant 0 : i32
    %c0_i32_1 = arith.constant 0 : i32
    return %arg0, %c0_i32, %c0_i32_0 : i32, i32, i32
  }
}

module attributes {stable_mosaic.version = 11 : i64} {
  func.func @_encoder_layer_kernel(%arg0: i32, %arg1: memref<1x8x128xf32, #tpu.memory_space<vmem>>, %arg2: memref<128x128xbf16, #tpu.memory_space<vmem>>, %arg3: memref<1x128xf32, #tpu.memory_space<vmem>>, %arg4: memref<128x128xbf16, #tpu.memory_space<vmem>>, %arg5: memref<1x128xf32, #tpu.memory_space<vmem>>, %arg6: memref<128x128xbf16, #tpu.memory_space<vmem>>, %arg7: memref<1x128xf32, #tpu.memory_space<vmem>>, %arg8: memref<128x128xbf16, #tpu.memory_space<vmem>>, %arg9: memref<1x128xf32, #tpu.memory_space<vmem>>, %arg10: memref<1x128xf32, #tpu.memory_space<vmem>>, %arg11: memref<1x128xf32, #tpu.memory_space<vmem>>, %arg12: memref<128x128xbf16, #tpu.memory_space<vmem>>, %arg13: memref<1x128xf32, #tpu.memory_space<vmem>>, %arg14: memref<128x128xbf16, #tpu.memory_space<vmem>>, %arg15: memref<1x128xf32, #tpu.memory_space<vmem>>, %arg16: memref<1x128xf32, #tpu.memory_space<vmem>>, %arg17: memref<1x128xf32, #tpu.memory_space<vmem>>, %arg18: memref<1x128xf32, #tpu.memory_space<vmem>>, %arg19: memref<1x128xf32, #tpu.memory_space<vmem>>, %arg20: memref<1x8x128xbf16, #tpu.memory_space<vmem>>, %arg21: memref<1x8x8xbf16, #tpu.memory_space<vmem>>) attributes {dimension_semantics = [#tpu.dimension_semantics<parallel>], iteration_bounds = array<i64: 2>, scalar_prefetch = 0 : i64, scratch_operands = 0 : i64, tpu.core_type = #tpu.core_type<tc>, window_params = [{transform_indices = @transform_0, window_bounds = array<i64: 1, 8, 128>}, {pipeline_mode = #tpu.pipeline_mode<synchronous>, transform_indices = @transform_1, window_bounds = array<i64: 128, 128>}, {pipeline_mode = #tpu.pipeline_mode<synchronous>, transform_indices = @transform_2, window_bounds = array<i64: 1, 128>}, {pipeline_mode = #tpu.pipeline_mode<synchronous>, transform_indices = @transform_3, window_bounds = array<i64: 128, 128>}, {pipeline_mode = #tpu.pipeline_mode<synchronous>, transform_indices = @transform_4, window_bounds = array<i64: 1, 128>}, {pipeline_mode = #tpu.pipeline_mode<synchronous>, transform_indices = @transform_5, window_bounds = array<i64: 128, 128>}, {pipeline_mode = #tpu.pipeline_mode<synchronous>, transform_indices = @transform_6, window_bounds = array<i64: 1, 128>}, {pipeline_mode = #tpu.pipeline_mode<synchronous>, transform_indices = @transform_7, window_bounds = array<i64: 128, 128>}, {pipeline_mode = #tpu.pipeline_mode<synchronous>, transform_indices = @transform_8, window_bounds = array<i64: 1, 128>}, {pipeline_mode = #tpu.pipeline_mode<synchronous>, transform_indices = @transform_9, window_bounds = array<i64: 1, 128>}, {pipeline_mode = #tpu.pipeline_mode<synchronous>, transform_indices = @transform_10, window_bounds = array<i64: 1, 128>}, {pipeline_mode = #tpu.pipeline_mode<synchronous>, transform_indices = @transform_11, window_bounds = array<i64: 128, 128>}, {pipeline_mode = #tpu.pipeline_mode<synchronous>, transform_indices = @transform_12, window_bounds = array<i64: 1, 128>}, {pipeline_mode = #tpu.pipeline_mode<synchronous>, transform_indices = @transform_13, window_bounds = array<i64: 128, 128>}, {pipeline_mode = #tpu.pipeline_mode<synchronous>, transform_indices = @transform_14, window_bounds = array<i64: 1, 128>}, {pipeline_mode = #tpu.pipeline_mode<synchronous>, transform_indices = @transform_15, window_bounds = array<i64: 1, 128>}, {pipeline_mode = #tpu.pipeline_mode<synchronous>, transform_indices = @transform_16, window_bounds = array<i64: 1, 128>}, {pipeline_mode = #tpu.pipeline_mode<synchronous>, transform_indices = @transform_17, window_bounds = array<i64: 1, 128>}, {pipeline_mode = #tpu.pipeline_mode<synchronous>, transform_indices = @transform_18, window_bounds = array<i64: 1, 128>}, {transform_indices = @transform_19, window_bounds = array<i64: 1, 8, 128>}, {transform_indices = @transform_20, window_bounds = array<i64: 1, 8, 8>}]} {
    %c0 = arith.constant 0 : index
    %c0_0 = arith.constant 0 : index
    %c0_1 = arith.constant 0 : index
    %0 = vector.load %arg1[%c0, %c0_0, %c0_1] : memref<1x8x128xf32, #tpu.memory_space<vmem>>, vector<1x8x128xf32>
    %1 = vector.shape_cast %0 : vector<1x8x128xf32> to vector<8x128xf32>
    %2 = arith.truncf %1 : vector<8x128xf32> to vector<8x128xbf16>
    %3 = vector.shape_cast %0 : vector<1x8x128xf32> to vector<8x128xf32>
    %c0_2 = arith.constant 0 : index
    %c0_3 = arith.constant 0 : index
    %4 = vector.load %arg2[%c0_2, %c0_3] : memref<128x128xbf16, #tpu.memory_space<vmem>>, vector<128x128xbf16>
    %cst = arith.constant dense<0.000000e+00> : vector<8x128xf32>
    %5 = tpu.matmul %2, %4, %cst {dimension_numbers = #tpu.dot_dimension_numbers<[1], [0], [0], [1], [0, 0, 1, 1], [], []>} : vector<8x128xbf16>, vector<128x128xbf16>, vector<8x128xf32> -> vector<8x128xf32>
    %c0_4 = arith.constant 0 : index
    %c0_5 = arith.constant 0 : index
    %6 = vector.load %arg3[%c0_4, %c0_5] : memref<1x128xf32, #tpu.memory_space<vmem>>, vector<1x128xf32>
    %7 = vector.broadcast %6 : vector<1x128xf32> to vector<8x128xf32>
    %8 = arith.addf %5, %7 : vector<8x128xf32>
    %c0_6 = arith.constant 0 : index
    %c0_7 = arith.constant 0 : index
    %9 = vector.load %arg4[%c0_6, %c0_7] : memref<128x128xbf16, #tpu.memory_space<vmem>>, vector<128x128xbf16>
    %cst_8 = arith.constant dense<0.000000e+00> : vector<8x128xf32>
    %10 = tpu.matmul %2, %9, %cst_8 {dimension_numbers = #tpu.dot_dimension_numbers<[1], [0], [0], [1], [0, 0, 1, 1], [], []>} : vector<8x128xbf16>, vector<128x128xbf16>, vector<8x128xf32> -> vector<8x128xf32>
    %c0_9 = arith.constant 0 : index
    %c0_10 = arith.constant 0 : index
    %11 = vector.load %arg5[%c0_9, %c0_10] : memref<1x128xf32, #tpu.memory_space<vmem>>, vector<1x128xf32>
    %12 = vector.broadcast %11 : vector<1x128xf32> to vector<8x128xf32>
    %13 = arith.addf %10, %12 : vector<8x128xf32>
    %c0_11 = arith.constant 0 : index
    %c0_12 = arith.constant 0 : index
    %14 = vector.load %arg6[%c0_11, %c0_12] : memref<128x128xbf16, #tpu.memory_space<vmem>>, vector<128x128xbf16>
    %cst_13 = arith.constant dense<0.000000e+00> : vector<8x128xf32>
    %15 = tpu.matmul %2, %14, %cst_13 {dimension_numbers = #tpu.dot_dimension_numbers<[1], [0], [0], [1], [0, 0, 1, 1], [], []>} : vector<8x128xbf16>, vector<128x128xbf16>, vector<8x128xf32> -> vector<8x128xf32>
    %c0_14 = arith.constant 0 : index
    %c0_15 = arith.constant 0 : index
    %16 = vector.load %arg7[%c0_14, %c0_15] : memref<1x128xf32, #tpu.memory_space<vmem>>, vector<1x128xf32>
    %17 = vector.broadcast %16 : vector<1x128xf32> to vector<8x128xf32>
    %18 = arith.addf %15, %17 : vector<8x128xf32>
    %cst_16 = arith.constant 0.176776692 : f32
    %19 = vector.broadcast %cst_16 : f32 to vector<8x128xf32>
    %20 = arith.mulf %8, %19 : vector<8x128xf32>
    %21 = vector.shape_cast %20 : vector<8x128xf32> to vector<1x8x128xf32>
    %22 = arith.truncf %21 : vector<1x8x128xf32> to vector<1x8x128xbf16>
    %23 = vector.shape_cast %13 : vector<8x128xf32> to vector<1x8x128xf32>
    %24 = arith.truncf %23 : vector<1x8x128xf32> to vector<1x8x128xbf16>
    %25 = vector.shape_cast %18 : vector<8x128xf32> to vector<1x8x128xf32>
    %26 = arith.truncf %25 : vector<1x8x128xf32> to vector<1x8x128xbf16>
    "tpu.trace_start"() <{level = 10 : i32, message = "bqd,bkd->bqk"}> : () -> ()
    %cst_17 = arith.constant dense<0.000000e+00> : vector<1x8x8xf32>
    %27 = tpu.matmul %22, %24, %cst_17 {dimension_numbers = #tpu.dot_dimension_numbers<[2], [2], [1], [1], [0, 0, 0, 1, 1, 1], [0], [0]>} : vector<1x8x128xbf16>, vector<1x8x128xbf16>, vector<1x8x8xf32> -> vector<1x8x8xf32>
    "tpu.trace_stop"() : () -> ()
    %cst_18 = arith.constant dense<0xFF800000> : vector<1x8xf32>
    %28 = vector.multi_reduction <maximumf>, %27, %cst_18 [2] : vector<1x8x8xf32> to vector<1x8xf32>
    %29 = vector.shape_cast %28 : vector<1x8xf32> to vector<1x8x1xf32>
    %30 = vector.broadcast %29 : vector<1x8x1xf32> to vector<1x8x8xf32>
    %31 = arith.subf %27, %30 : vector<1x8x8xf32>
    %32 = math.exp %31 : vector<1x8x8xf32>
    %cst_19 = arith.constant dense<0.000000e+00> : vector<1x8xf32>
    %33 = vector.multi_reduction <add>, %32, %cst_19 [2] : vector<1x8x8xf32> to vector<1x8xf32>
    %34 = vector.shape_cast %33 : vector<1x8xf32> to vector<1x8x1xf32>
    %35 = tpu.reciprocal %34 : vector<1x8x1xf32> -> vector<1x8x1xf32>
    %36 = vector.broadcast %35 : vector<1x8x1xf32> to vector<1x8x8xf32>
    %37 = arith.mulf %32, %36 : vector<1x8x8xf32>
    %38 = arith.truncf %37 : vector<1x8x8xf32> to vector<1x8x8xbf16>
    %c0_20 = arith.constant 0 : index
    %c0_21 = arith.constant 0 : index
    %c0_22 = arith.constant 0 : index
    %39 = vector.load %arg21[%c0_20, %c0_21, %c0_22] : memref<1x8x8xbf16, #tpu.memory_space<vmem>>, vector<1x8x8xbf16>
    tpu.vector_store %arg21[%c0_20, %c0_21, %c0_22], %38 {strides = array<i32>} : memref<1x8x8xbf16, #tpu.memory_space<vmem>>, vector<1x8x8xbf16>,
    %40 = arith.truncf %37 : vector<1x8x8xf32> to vector<1x8x8xbf16>
    "tpu.trace_start"() <{level = 10 : i32, message = "bqk,bkd->bqd"}> : () -> ()
    %cst_23 = arith.constant dense<0.000000e+00> : vector<1x8x128xf32>
    %41 = tpu.matmul %40, %26, %cst_23 {dimension_numbers = #tpu.dot_dimension_numbers<[2], [1], [1], [2], [0, 0, 0, 1, 1, 2], [0], [0]>} : vector<1x8x8xbf16>, vector<1x8x128xbf16>, vector<1x8x128xf32> -> vector<1x8x128xf32>
    "tpu.trace_stop"() : () -> ()
    %42 = vector.shape_cast %41 : vector<1x8x128xf32> to vector<8x128xf32>
    %43 = arith.truncf %42 : vector<8x128xf32> to vector<8x128xbf16>
    %c0_24 = arith.constant 0 : index
    %c0_25 = arith.constant 0 : index
    %44 = vector.load %arg8[%c0_24, %c0_25] : memref<128x128xbf16, #tpu.memory_space<vmem>>, vector<128x128xbf16>
    %cst_26 = arith.constant dense<0.000000e+00> : vector<8x128xf32>
    %45 = tpu.matmul %43, %44, %cst_26 {dimension_numbers = #tpu.dot_dimension_numbers<[1], [0], [0], [1], [0, 0, 1, 1], [], []>} : vector<8x128xbf16>, vector<128x128xbf16>, vector<8x128xf32> -> vector<8x128xf32>
    %c0_27 = arith.constant 0 : index
    %c0_28 = arith.constant 0 : index
    %46 = vector.load %arg9[%c0_27, %c0_28] : memref<1x128xf32, #tpu.memory_space<vmem>>, vector<1x128xf32>
    %47 = vector.broadcast %46 : vector<1x128xf32> to vector<8x128xf32>
    %48 = arith.addf %45, %47 : vector<8x128xf32>
    %49 = arith.addf %3, %48 : vector<8x128xf32>
    %c0_29 = arith.constant 0 : index
    %c0_30 = arith.constant 0 : index
    %50 = vector.load %arg10[%c0_29, %c0_30] : memref<1x128xf32, #tpu.memory_space<vmem>>, vector<1x128xf32>
    %c0_31 = arith.constant 0 : index
    %c0_32 = arith.constant 0 : index
    %51 = vector.load %arg11[%c0_31, %c0_32] : memref<1x128xf32, #tpu.memory_space<vmem>>, vector<1x128xf32>
    %cst_33 = arith.constant dense<0.000000e+00> : vector<8xf32>
    %52 = vector.multi_reduction <add>, %49, %cst_33 [1] : vector<8x128xf32> to vector<8xf32>
    %53 = vector.shape_cast %52 : vector<8xf32> to vector<8x1xf32>
    %54 = arith.mulf %49, %49 : vector<8x128xf32>
    %cst_34 = arith.constant dense<0.000000e+00> : vector<8xf32>
    %55 = vector.multi_reduction <add>, %54, %cst_34 [1] : vector<8x128xf32> to vector<8xf32>
    %56 = vector.shape_cast %55 : vector<8xf32> to vector<8x1xf32>
    %cst_35 = arith.constant 3.125000e-02 : f32
    %57 = vector.broadcast %cst_35 : f32 to vector<8x1xf32>
    %58 = arith.mulf %53, %57 : vector<8x1xf32>
    %cst_36 = arith.constant 3.125000e-02 : f32
    %59 = vector.broadcast %cst_36 : f32 to vector<8x1xf32>
    %60 = arith.mulf %56, %59 : vector<8x1xf32>
    %61 = arith.mulf %58, %58 : vector<8x1xf32>
    %62 = arith.subf %60, %61 : vector<8x1xf32>
    %cst_37 = arith.constant 9.99999974E-6 : f32
    %63 = vector.broadcast %cst_37 : f32 to vector<8x1xf32>
    %64 = arith.addf %62, %63 : vector<8x1xf32>
    %65 = math.rsqrt %64 : vector<8x1xf32>
    %66 = vector.broadcast %58 : vector<8x1xf32> to vector<8x128xf32>
    %67 = arith.subf %49, %66 : vector<8x128xf32>
    %68 = vector.broadcast %65 : vector<8x1xf32> to vector<8x128xf32>
    %69 = arith.mulf %67, %68 : vector<8x128xf32>
    %70 = vector.broadcast %50 : vector<1x128xf32> to vector<8x128xf32>
    %71 = arith.mulf %69, %70 : vector<8x128xf32>
    %72 = vector.broadcast %51 : vector<1x128xf32> to vector<8x128xf32>
    %73 = arith.addf %71, %72 : vector<8x128xf32>
    %74 = arith.truncf %73 : vector<8x128xf32> to vector<8x128xbf16>
    %c0_38 = arith.constant 0 : index
    %c0_39 = arith.constant 0 : index
    %75 = vector.load %arg12[%c0_38, %c0_39] : memref<128x128xbf16, #tpu.memory_space<vmem>>, vector<128x128xbf16>
    %cst_40 = arith.constant dense<0.000000e+00> : vector<8x128xf32>
    %76 = tpu.matmul %74, %75, %cst_40 {dimension_numbers = #tpu.dot_dimension_numbers<[1], [0], [0], [1], [0, 0, 1, 1], [], []>} : vector<8x128xbf16>, vector<128x128xbf16>, vector<8x128xf32> -> vector<8x128xf32>
    %c0_41 = arith.constant 0 : index
    %c0_42 = arith.constant 0 : index
    %77 = vector.load %arg13[%c0_41, %c0_42] : memref<1x128xf32, #tpu.memory_space<vmem>>, vector<1x128xf32>
    %78 = vector.broadcast %77 : vector<1x128xf32> to vector<8x128xf32>
    %79 = arith.addf %76, %78 : vector<8x128xf32>
    %cst_43 = arith.constant 0.000000e+00 : f32
    %80 = vector.broadcast %cst_43 : f32 to vector<8x128xf32>
    %81 = arith.maximumf %79, %80 : vector<8x128xf32>
    %82 = arith.truncf %81 : vector<8x128xf32> to vector<8x128xbf16>
    %c0_44 = arith.constant 0 : index
    %c0_45 = arith.constant 0 : index
    %83 = vector.load %arg14[%c0_44, %c0_45] : memref<128x128xbf16, #tpu.memory_space<vmem>>, vector<128x128xbf16>
    %cst_46 = arith.constant dense<0.000000e+00> : vector<8x128xf32>
    %84 = tpu.matmul %82, %83, %cst_46 {dimension_numbers = #tpu.dot_dimension_numbers<[1], [0], [0], [1], [0, 0, 1, 1], [], []>} : vector<8x128xbf16>, vector<128x128xbf16>, vector<8x128xf32> -> vector<8x128xf32>
    %c0_47 = arith.constant 0 : index
    %c0_48 = arith.constant 0 : index
    %85 = vector.load %arg15[%c0_47, %c0_48] : memref<1x128xf32, #tpu.memory_space<vmem>>, vector<1x128xf32>
    %86 = vector.broadcast %85 : vector<1x128xf32> to vector<8x128xf32>
    %87 = arith.addf %84, %86 : vector<8x128xf32>
    %88 = arith.addf %73, %87 : vector<8x128xf32>
    %c0_49 = arith.constant 0 : index
    %c0_50 = arith.constant 0 : index
    %89 = vector.load %arg16[%c0_49, %c0_50] : memref<1x128xf32, #tpu.memory_space<vmem>>, vector<1x128xf32>
    %c0_51 = arith.constant 0 : index
    %c0_52 = arith.constant 0 : index
    %90 = vector.load %arg17[%c0_51, %c0_52] : memref<1x128xf32, #tpu.memory_space<vmem>>, vector<1x128xf32>
    %cst_53 = arith.constant dense<0.000000e+00> : vector<8xf32>
    %91 = vector.multi_reduction <add>, %88, %cst_53 [1] : vector<8x128xf32> to vector<8xf32>
    %92 = vector.shape_cast %91 : vector<8xf32> to vector<8x1xf32>
    %93 = arith.mulf %88, %88 : vector<8x128xf32>
    %cst_54 = arith.constant dense<0.000000e+00> : vector<8xf32>
    %94 = vector.multi_reduction <add>, %93, %cst_54 [1] : vector<8x128xf32> to vector<8xf32>
    %95 = vector.shape_cast %94 : vector<8xf32> to vector<8x1xf32>
    %cst_55 = arith.constant 3.125000e-02 : f32
    %96 = vector.broadcast %cst_55 : f32 to vector<8x1xf32>
    %97 = arith.mulf %92, %96 : vector<8x1xf32>
    %cst_56 = arith.constant 3.125000e-02 : f32
    %98 = vector.broadcast %cst_56 : f32 to vector<8x1xf32>
    %99 = arith.mulf %95, %98 : vector<8x1xf32>
    %100 = arith.mulf %97, %97 : vector<8x1xf32>
    %101 = arith.subf %99, %100 : vector<8x1xf32>
    %cst_57 = arith.constant 9.99999974E-6 : f32
    %102 = vector.broadcast %cst_57 : f32 to vector<8x1xf32>
    %103 = arith.addf %101, %102 : vector<8x1xf32>
    %104 = math.rsqrt %103 : vector<8x1xf32>
    %105 = vector.broadcast %97 : vector<8x1xf32> to vector<8x128xf32>
    %106 = arith.subf %88, %105 : vector<8x128xf32>
    %107 = vector.broadcast %104 : vector<8x1xf32> to vector<8x128xf32>
    %108 = arith.mulf %106, %107 : vector<8x128xf32>
    %109 = vector.broadcast %89 : vector<1x128xf32> to vector<8x128xf32>
    %110 = arith.mulf %108, %109 : vector<8x128xf32>
    %111 = vector.broadcast %90 : vector<1x128xf32> to vector<8x128xf32>
    %112 = arith.addf %110, %111 : vector<8x128xf32>
    %113 = vector.shape_cast %112 : vector<8x128xf32> to vector<1x8x128xf32>
    %114 = arith.truncf %113 : vector<1x8x128xf32> to vector<1x8x128xbf16>
    %c0_58 = arith.constant 0 : index
    %c0_59 = arith.constant 0 : index
    %c0_60 = arith.constant 0 : index
    %115 = vector.load %arg20[%c0_58, %c0_59, %c0_60] : memref<1x8x128xbf16, #tpu.memory_space<vmem>>, vector<1x8x128xbf16>
    tpu.vector_store %arg20[%c0_58, %c0_59, %c0_60], %114 {strides = array<i32>} : memref<1x8x128xbf16, #tpu.memory_space<vmem>>, vector<1x8x128xbf16>,
    return
  }
  func.func @transform_0(%arg0: i32) -> (i32, i32, i32) {
    %c0_i32 = arith.constant 0 : i32
    %c0_i32_0 = arith.constant 0 : i32
    %c0_i32_1 = arith.constant 0 : i32
    return %arg0, %c0_i32, %c0_i32_0 : i32, i32, i32
  }
  func.func @transform_1(%arg0: i32) -> (i32, i32) {
    %c0_i32 = arith.constant 0 : i32
    %c0_i32_0 = arith.constant 0 : i32
    %c0_i32_1 = arith.constant 0 : i32
    return %c0_i32, %c0_i32_0 : i32, i32
  }
  func.func @transform_2(%arg0: i32) -> (i32, i32) {
    %c0_i32 = arith.constant 0 : i32
    %c0_i32_0 = arith.constant 0 : i32
    %c0_i32_1 = arith.constant 0 : i32
    return %c0_i32, %c0_i32_0 : i32, i32
  }
  func.func @transform_3(%arg0: i32) -> (i32, i32) {
    %c0_i32 = arith.constant 0 : i32
    %c0_i32_0 = arith.constant 0 : i32
    %c0_i32_1 = arith.constant 0 : i32
    return %c0_i32, %c0_i32_0 : i32, i32
  }
  func.func @transform_4(%arg0: i32) -> (i32, i32) {
    %c0_i32 = arith.constant 0 : i32
    %c0_i32_0 = arith.constant 0 : i32
    %c0_i32_1 = arith.constant 0 : i32
    return %c0_i32, %c0_i32_0 : i32, i32
  }
  func.func @transform_5(%arg0: i32) -> (i32, i32) {
    %c0_i32 = arith.constant 0 : i32
    %c0_i32_0 = arith.constant 0 : i32
    %c0_i32_1 = arith.constant 0 : i32
    return %c0_i32, %c0_i32_0 : i32, i32
  }
  func.func @transform_6(%arg0: i32) -> (i32, i32) {
    %c0_i32 = arith.constant 0 : i32
    %c0_i32_0 = arith.constant 0 : i32
    %c0_i32_1 = arith.constant 0 : i32
    return %c0_i32, %c0_i32_0 : i32, i32
  }
  func.func @transform_7(%arg0: i32) -> (i32, i32) {
    %c0_i32 = arith.constant 0 : i32
    %c0_i32_0 = arith.constant 0 : i32
    %c0_i32_1 = arith.constant 0 : i32
    return %c0_i32, %c0_i32_0 : i32, i32
  }
  func.func @transform_8(%arg0: i32) -> (i32, i32) {
    %c0_i32 = arith.constant 0 : i32
    %c0_i32_0 = arith.constant 0 : i32
    %c0_i32_1 = arith.constant 0 : i32
    return %c0_i32, %c0_i32_0 : i32, i32
  }
  func.func @transform_9(%arg0: i32) -> (i32, i32) {
    %c0_i32 = arith.constant 0 : i32
    %c0_i32_0 = arith.constant 0 : i32
    %c0_i32_1 = arith.constant 0 : i32
    return %c0_i32, %c0_i32_0 : i32, i32
  }
  func.func @transform_10(%arg0: i32) -> (i32, i32) {
    %c0_i32 = arith.constant 0 : i32
    %c0_i32_0 = arith.constant 0 : i32
    %c0_i32_1 = arith.constant 0 : i32
    return %c0_i32, %c0_i32_0 : i32, i32
  }
  func.func @transform_11(%arg0: i32) -> (i32, i32) {
    %c0_i32 = arith.constant 0 : i32
    %c0_i32_0 = arith.constant 0 : i32
    %c0_i32_1 = arith.constant 0 : i32
    return %c0_i32, %c0_i32_0 : i32, i32
  }
  func.func @transform_12(%arg0: i32) -> (i32, i32) {
    %c0_i32 = arith.constant 0 : i32
    %c0_i32_0 = arith.constant 0 : i32
    %c0_i32_1 = arith.constant 0 : i32
    return %c0_i32, %c0_i32_0 : i32, i32
  }
  func.func @transform_13(%arg0: i32) -> (i32, i32) {
    %c0_i32 = arith.constant 0 : i32
    %c0_i32_0 = arith.constant 0 : i32
    %c0_i32_1 = arith.constant 0 : i32
    return %c0_i32, %c0_i32_0 : i32, i32
  }
  func.func @transform_14(%arg0: i32) -> (i32, i32) {
    %c0_i32 = arith.constant 0 : i32
    %c0_i32_0 = arith.constant 0 : i32
    %c0_i32_1 = arith.constant 0 : i32
    return %c0_i32, %c0_i32_0 : i32, i32
  }
  func.func @transform_15(%arg0: i32) -> (i32, i32) {
    %c0_i32 = arith.constant 0 : i32
    %c0_i32_0 = arith.constant 0 : i32
    %c0_i32_1 = arith.constant 0 : i32
    return %c0_i32, %c0_i32_0 : i32, i32
  }
  func.func @transform_16(%arg0: i32) -> (i32, i32) {
    %c0_i32 = arith.constant 0 : i32
    %c0_i32_0 = arith.constant 0 : i32
    %c0_i32_1 = arith.constant 0 : i32
    return %c0_i32, %c0_i32_0 : i32, i32
  }
  func.func @transform_17(%arg0: i32) -> (i32, i32) {
    %c0_i32 = arith.constant 0 : i32
    %c0_i32_0 = arith.constant 0 : i32
    %c0_i32_1 = arith.constant 0 : i32
    return %c0_i32, %c0_i32_0 : i32, i32
  }
  func.func @transform_18(%arg0: i32) -> (i32, i32) {
    %c0_i32 = arith.constant 0 : i32
    %c0_i32_0 = arith.constant 0 : i32
    %c0_i32_1 = arith.constant 0 : i32
    return %c0_i32, %c0_i32_0 : i32, i32
  }
  func.func @transform_19(%arg0: i32) -> (i32, i32, i32) {
    %c0_i32 = arith.constant 0 : i32
    %c0_i32_0 = arith.constant 0 : i32
    %c0_i32_1 = arith.constant 0 : i32
    return %arg0, %c0_i32, %c0_i32_0 : i32, i32, i32
  }
  func.func @transform_20(%arg0: i32) -> (i32, i32, i32) {
    %c0_i32 = arith.constant 0 : i32
    %c0_i32_0 = arith.constant 0 : i32
    %c0_i32_1 = arith.constant 0 : i32
    return %arg0, %c0_i32, %c0_i32_0 : i32, i32, i32
  }
}

</mosaic_0001>

<bundles_post_ra>
// kernel: tpu_custom_call.1
= control target key start
LH: loop header
LB: loop body
LE: loop exit
PB: predicated region body
PF: predicated region fallthrough
CT: control target
= control target key end

     0   :  { %s3132_s0 = inlined_call_operand.hbm [shape: f32[2,8,128], index: 0, kind: input, shape index: {}]   ;;  %s3133_s1 = inlined_call_operand.hbm [shape: bf16[128,128], index: 1, kind: input, shape index: {}]   ;;  %s3134_s2 = inlined_call_operand.vmem [shape: f32[1,128], index: 2, kind: input, shape index: {}]   ;;  %s3135_s3 = inlined_call_operand.hbm [shape: bf16[128,128], index: 3, kind: input, shape index: {}]   ;;  %s3136_s4 = inlined_call_operand.vmem [shape: f32[1,128], index: 4, kind: input, shape index: {}]   ;;  %s3137_s5 = inlined_call_operand.hbm [shape: bf16[128,128], index: 5, kind: input, shape index: {}]   ;;  %s3138_s6 = inlined_call_operand.vmem [shape: f32[1,128], index: 6, kind: input, shape index: {}]   ;;  %s3139_s7 = inlined_call_operand.hbm [shape: bf16[128,128], index: 7, kind: input, shape index: {}]   ;;  %s3140_s8 = inlined_call_operand.vmem [shape: f32[1,128], index: 8, kind: input, shape index: {}]   ;;  %s3141_s9 = inlined_call_operand.vmem [shape: f32[1,128], index: 9, kind: input, shape index: {}]   ;;  %s3142_s10 = inlined_call_operand.vmem [shape: f32[1,128], index: 10, kind: input, shape index: {}]   ;;  %s3143_s11 = inlined_call_operand.hbm [shape: bf16[128,128], index: 11, kind: input, shape index: {}]   ;;  %s3144_s12 = inlined_call_operand.vmem [shape: f32[1,128], index: 12, kind: input, shape index: {}]   ;;  %s3145_s13 = inlined_call_operand.hbm [shape: bf16[128,128], index: 13, kind: input, shape index: {}]   ;;  %s3146_s14 = inlined_call_operand.vmem [shape: f32[1,128], index: 14, kind: input, shape index: {}]   ;;  %s3147_s15 = inlined_call_operand.vmem [shape: f32[1,128], index: 15, kind: input, shape index: {}]   ;;  %s3148_s16 = inlined_call_operand.vmem [shape: f32[1,128], index: 16, kind: input, shape index: {}]   ;;  %s3149_s17 = inlined_call_operand.vmem [shape: f32[1,128], index: 17, kind: input, shape index: {}]   ;;  %s3150_s18 = inlined_call_operand.vmem [shape: f32[1,128], index: 18, kind: input, shape index: {}]   ;;  %s3151_s19 = inlined_call_operand.hbm [shape: bf16[2,8,128], index: 19, kind: output, shape index: {0}]   ;;  %s3152_s20 = inlined_call_operand.hbm [shape: bf16[2,8,8], index: 20, kind: output, shape index: {1}]  }
   0x1   :  { %3163 = sst [smem:[#allocation23_spill]] %s3132_s0 }
   0x2   :  { %3164 = sst [smem:[#allocation24_spill]] %s3133_s1 }
   0x3   :  { %3165 = sst [smem:[#allocation25_spill]] %s3134_s2 }
   0x4   :  { %3166 = sst [smem:[#allocation26_spill]] %s3135_s3 }
   0x5   :  { %3167 = sst [smem:[#allocation27_spill]] %s3136_s4 }
   0x6   :  { %3168 = sst [smem:[#allocation28_spill]] %s3137_s5 }
   0x7   :  { %3169 = sst [smem:[#allocation29_spill]] %s3138_s6 }
   0x8   :  { %3170 = sst [smem:[#allocation30_spill]] %s3139_s7 }
   0x9   :  { %3171 = sst [smem:[#allocation31_spill]] %s3140_s8 }
   0xa   :  { %3172 = sst [smem:[#allocation32_spill]] %s3144_s12 }
   0xb   :  { %3173 = sst [smem:[#allocation33_spill]] %s3146_s14 }
   0xc   :  { %3174 = sst [smem:[#allocation34_spill]] %s3147_s15 }
   0xd   :  { %3175 = sst [smem:[#allocation35_spill]] %s3148_s16 }
   0xe   :  { %3176 = sst [smem:[#allocation36_spill]] %s3151_s19 }
   0xf   :  { %3177 = sst [smem:[#allocation37_spill]] %s3152_s20 }
  0x10   :  { %26 = vsyncpa [#allocation3], 0 }
  0x11   :  { %28 = vsyncpa [#allocation3 + $0x1], 0 }
  0x12   :  { %29 = vsyncpa [#allocation6], 0 }
  0x13   :  { %30 = vsyncpa [#allocation9], 0 }
  0x14   :  { %31 = vsyncpa [#allocation12], 0 }
  0x15   :  { %32 = vsyncpa [#allocation4], 0 }
  0x16   :  { %34 = vsyncpa [#allocation4 + $0x1], 0 }
  0x17   :  { %35 = vsyncpa [#allocation16], 0 }
  0x18   :  { %37 = vsyncpa [#allocation16 + $0x1], 0  ;;  %s2651_s1 = smov 0   ;;  %s2653_s17 = smov 0  }
  0x19   :  { %s2655_s18 = smov 0   ;;  %s2657_s22 = smov 0  }
  0x1a LB: > { %s2533_s23 = smov [#allocation5]   ;;  %s2672_s2 = sadd.s32 4294967295, %s2531_s22   ;;  %s2531_s22 = sphi %s2657_s22, %s3216_s22   ;;  %s2527_s18 = sphi %s2655_s18, %s3215_s18   ;;  %s2523_s17 = sphi %s2653_s17, %s3214_s17   ;;  %s2519_s1 = sphi %s2651_s1, %s3213_s1  }
  0x1b   : > { %s516_s24 = sshll.u32 %s2533_s23, 4  ;;  %p1776_p0 = scmp.ge.s32.totalorder %s2531_s22, 1  ;;  %s2677_s24 = int_to_ptr.vmem [resolvable:$true] %s516_s24 }
  0x1c   : > { %p3159_p1 = scmp.eq.s32.totalorder %s2672_s2, 0  ;;  %p504_p2 = scmp.lt.s32.totalorder %s2531_s22, 3 }
  0x1d   : > { %s2534_s3 = smov [#allocation8]   ;;  %s2535_s28 = smov [#allocation11]  }
  0x1e   : > { %p2679_p3 = pnand %p1776_p0, %p504_p2  ;;  %s548_s26 = sshll.u32 %s2534_s3, 4  ;;  %s2692_s26 = int_to_ptr.vmem [resolvable:$true] %s548_s26 }
  0x1f   : > { %s586_s4 = sshll.u32 %s2535_s28, 4  ;;  %s3180_s0 = sld [smem:[#allocation24_spill]]  ;;  %s2694_s4 = int_to_ptr.vmem [resolvable:$true] %s586_s4 }
  0x20   : > { %s3178_s25 = scalar_select %p2679_p3, 1, 0 }
  0x21   : > { %p2081_p5 = pneg %p2679_p3 }
  0x23   : > { %p2688_p6 = pnand %p2081_p5, %p3159_p1 }
  0x25   : > { %s2223_s21 = scalar_lea.hbm %s3180_s0, 1024  ;;  %p2704_p8 = pneg %p2688_p6 }
  0x26   : > { %p2224_p7 = scmp.ne.s32.totalorder %s3180_s0, %s2223_s21  ;;  %p2230_p11 = scmp.lt.u32.totalorder %s2223_s21, %s3180_s0 }
  0x28   : > { %p2226_p9 = pnand %p2704_p8, %p2224_p7 }
  0x2a   : > { %p2227_p10 = pneg %p2226_p9 }
  0x2c   : > { %p2232_p12 = pnand %p2230_p11, %p2227_p10 }
  0x2e   : > { %2235 = shalt.err (!%p2232_p12)
}
  0x2f   : > { %s2236_s19 = scalar_lea.vmem %s2677_s24, 1024  ;;  %p2244_p5 = scmp.lt.s32.totalorder %s2677_s24, %s2677_s24 }
  0x30   : > { %p2237_p13 = scmp.ne.s32.totalorder %s2677_s24, %s2236_s19  ;;  %p2245_p4 = scmp.lt.s32.totalorder %s2236_s19, %s2236_s19 }
  0x32   : > { %p2239_p0 = pnand %p2237_p13, %p2704_p8  ;;  %p2246_p7 = por %p2245_p4, %p2244_p5 }
  0x34   : > { %p2240_p2 = pneg %p2239_p0 }
  0x36   : > { %p2247_p9 = pnand %p2246_p7, %p2240_p2 }
  0x38   : > { %2250 = shalt.err (!%p2247_p9)
}
  0x39   : > { %s2536_s29 = smov 64   ;;  %s2537_s16 = smov 4  }
  0x3a   : > { %2084 = dma.hbm_to_vmem [thread:$0]  (!%p2688_p6), %s3180_s0, 1024, %s2677_s24, [#allocation6], %s2536_s29, %s2536_s29, %s2537_s16  }
  0x3b   : > { %s3182_s5 = sld [smem:[#allocation28_spill]] }
  0x41   : > { %s2251_s19 = scalar_lea.hbm %s3182_s5, 1024 }
  0x42   : > { %p2252_p4 = scmp.ne.s32.totalorder %s3182_s5, %s2251_s19  ;;  %p2258_p12 = scmp.lt.u32.totalorder %s2251_s19, %s3182_s5 }
  0x44   : > { %p2254_p10 = pnand %p2252_p4, %p2704_p8 }
  0x46   : > { %p2255_p11 = pneg %p2254_p10 }
  0x48   : > { %p2260_p13 = pnand %p2258_p12, %p2255_p11 }
  0x4a   : > { %2263 = shalt.err (!%p2260_p13)
}
  0x4b   : > { %s2264_s24 = scalar_lea.vmem %s2692_s26, 1024  ;;  %p2272_p7 = scmp.lt.s32.totalorder %s2692_s26, %s2692_s26 }
  0x4c   : > { %p2265_p0 = scmp.ne.s32.totalorder %s2692_s26, %s2264_s24  ;;  %p2273_p9 = scmp.lt.s32.totalorder %s2264_s24, %s2264_s24 }
  0x4e   : > { %p2267_p2 = pnand %p2265_p0, %p2704_p8  ;;  %p2274_p4 = por %p2273_p9, %p2272_p7 }
  0x50   : > { %p2268_p5 = pneg %p2267_p2 }
  0x52   : > { %p2275_p10 = pnand %p2274_p4, %p2268_p5 }
  0x54   : > { %2278 = shalt.err (!%p2275_p10)
}
  0x55   : > { %2090 = dma.hbm_to_vmem [thread:$0]  (!%p2688_p6), %s3182_s5, 1024, %s2692_s26, [#allocation9], %s2536_s29, %s2536_s29, %s2537_s16  }
  0x56   : > { %s2279_s30 = scalar_lea.hbm %s3143_s11, 1024 }
  0x57   : > { %p2280_p11 = scmp.ne.s32.totalorder %s3143_s11, %s2279_s30  ;;  %p2286_p0 = scmp.lt.u32.totalorder %s2279_s30, %s3143_s11 }
  0x59   : > { %p2282_p12 = pnand %p2280_p11, %p2704_p8 }
  0x5b   : > { %p2283_p13 = pneg %p2282_p12 }
  0x5d   : > { %p2288_p2 = pnand %p2286_p0, %p2283_p13 }
  0x5f   : > { %2291 = shalt.err (!%p2288_p2)
}
  0x60   : > { %s2292_s26 = scalar_lea.vmem %s2694_s4, 1024  ;;  %p2300_p4 = scmp.lt.s32.totalorder %s2694_s4, %s2694_s4 }
  0x61   : > { %p2293_p5 = scmp.ne.s32.totalorder %s2694_s4, %s2292_s26  ;;  %p2301_p10 = scmp.lt.s32.totalorder %s2292_s26, %s2292_s26 }
  0x63   : > { %p2295_p7 = pnand %p2293_p5, %p2704_p8  ;;  %p2302_p11 = por %p2301_p10, %p2300_p4 }
  0x65   : > { %p2296_p9 = pneg %p2295_p7 }
  0x67   : > { %p2303_p12 = pnand %p2302_p11, %p2296_p9 }
  0x69   : > { %2306 = shalt.err (!%p2303_p12)
}
  0x6a   : > { %2096 = dma.hbm_to_vmem [thread:$0]  (!%p2688_p6), %s3143_s11, 1024, %s2694_s4, [#allocation12], %s2536_s29, %s2536_s29, %s2537_s16  }
  0x6b   : > { %s2538_s14 = smov [#allocation7]   ;;  %s2539_s20 = smov [#allocation10]  }
  0x6c   : > { %s532_s15 = sshll.u32 %s2538_s14, 4  ;;  %s564_s30 = sshll.u32 %s2539_s20, 4  ;;  %s533_s15 = int_to_ptr.vmem [resolvable:$true] %s532_s15  ;;  %s565_s30 = int_to_ptr.vmem [resolvable:$true] %s564_s30 }
  0x6d   : > { %s3183_s28 = sld [smem:[#allocation26_spill]] }
  0x73   : > { %s2307_s19 = scalar_lea.hbm %s3183_s28, 1024 }
  0x74   : > { %p2308_p13 = scmp.ne.s32.totalorder %s3183_s28, %s2307_s19  ;;  %p2314_p5 = scmp.lt.u32.totalorder %s2307_s19, %s3183_s28 }
  0x76   : > { %p2310_p0 = pnand %p2308_p13, %p2704_p8 }
  0x78   : > { %p2311_p2 = pneg %p2310_p0 }
  0x7a   : > { %p2316_p7 = pnand %p2314_p5, %p2311_p2 }
  0x7c   : > { %2319 = shalt.err (!%p2316_p7)
}
  0x7d   : > { %s2320_s4 = scalar_lea.vmem %s533_s15, 1024  ;;  %p2328_p11 = scmp.lt.s32.totalorder %s533_s15, %s533_s15 }
  0x7e   : > { %p2321_p9 = scmp.ne.s32.totalorder %s533_s15, %s2320_s4  ;;  %p2329_p12 = scmp.lt.s32.totalorder %s2320_s4, %s2320_s4 }
  0x80   : > { %p2323_p4 = pnand %p2321_p9, %p2704_p8  ;;  %p2330_p1 = por %p2329_p12, %p2328_p11 }
  0x82   : > { %p2324_p10 = pneg %p2323_p4 }
  0x84   : > { %p2331_p3 = pnand %p2330_p1, %p2324_p10 }
  0x86   : > { %2334 = shalt.err (!%p2331_p3)
}
  0x87   : > { %2087 = dma.hbm_to_vmem [thread:$0]  (!%p2688_p6), %s3183_s28, 1024, %s533_s15, [#allocation6], %s2536_s29, %s2536_s29, %s2537_s16  }
  0x88   : > { %s3184_s7 = sld [smem:[#allocation30_spill]] }
  0x8e   : > { %s2335_s20 = scalar_lea.hbm %s3184_s7, 1024 }
  0x8f   : > { %p2336_p1 = scmp.ne.s32.totalorder %s3184_s7, %s2335_s20  ;;  %p2342_p0 = scmp.lt.u32.totalorder %s2335_s20, %s3184_s7 }
  0x91   : > { %p2338_p3 = pnand %p2336_p1, %p2704_p8 }
  0x93   : > { %p2339_p13 = pneg %p2338_p3 }
  0x95   : > { %p2344_p2 = pnand %p2342_p0, %p2339_p13 }
  0x97   : > { %2347 = shalt.err (!%p2344_p2)
}
  0x98   : > { %s2348_s24 = scalar_lea.vmem %s565_s30, 1024  ;;  %p2356_p4 = scmp.lt.s32.totalorder %s565_s30, %s565_s30 }
  0x99   : > { %p2349_p5 = scmp.ne.s32.totalorder %s565_s30, %s2348_s24  ;;  %p2357_p10 = scmp.lt.s32.totalorder %s2348_s24, %s2348_s24 }
  0x9b   : > { %p2351_p7 = pnand %p2349_p5, %p2704_p8  ;;  %p2358_p11 = por %p2357_p10, %p2356_p4 }
  0x9d   : > { %p2352_p9 = pneg %p2351_p7 }
  0x9f   : > { %p2359_p12 = pnand %p2358_p11, %p2352_p9 }
  0xa1   : > { %2362 = shalt.err (!%p2359_p12)
}
  0xa2   : > { %2093 = dma.hbm_to_vmem [thread:$0]  (!%p2688_p6), %s3184_s7, 1024, %s565_s30, [#allocation9], %s2536_s29, %s2536_s29, %s2537_s16  }
  0xa3   : > { %s2540_s5 = smov [#allocation13]   ;;  %s2363_s20 = scalar_lea.hbm %s3145_s13, 1024 }
  0xa4   : > { %s602_s0 = sshll.u32 %s2540_s5, 4  ;;  %p2364_p1 = scmp.ne.s32.totalorder %s3145_s13, %s2363_s20  ;;  %s603_s0 = int_to_ptr.vmem [resolvable:$true] %s602_s0 }
  0xa5   : > { %p2370_p0 = scmp.lt.u32.totalorder %s2363_s20, %s3145_s13 }
  0xa6   : > { %p2366_p3 = pnand %p2364_p1, %p2704_p8 }
  0xa8   : > { %p2367_p13 = pneg %p2366_p3 }
  0xaa   : > { %p2372_p2 = pnand %p2370_p0, %p2367_p13 }
  0xac   : > { %2375 = shalt.err (!%p2372_p2)
}
  0xad   : > { %s2376_s30 = scalar_lea.vmem %s603_s0, 1024  ;;  %p2384_p4 = scmp.lt.s32.totalorder %s603_s0, %s603_s0 }
  0xae   : > { %p2377_p5 = scmp.ne.s32.totalorder %s603_s0, %s2376_s30  ;;  %p2385_p10 = scmp.lt.s32.totalorder %s2376_s30, %s2376_s30 }
  0xb0   : > { %p2379_p7 = pnand %p2377_p5, %p2704_p8  ;;  %p2386_p11 = por %p2385_p10, %p2384_p4 }
  0xb2   : > { %p2380_p9 = pneg %p2379_p7 }
  0xb4   : > { %p2387_p12 = pnand %p2386_p11, %p2380_p9 }
  0xb6   : > { %2390 = shalt.err (!%p2387_p12)
}
  0xb7   : > { %2099 = dma.hbm_to_vmem [thread:$0]  (!%p2688_p6), %s3145_s13, 1024, %s603_s0, [#allocation12], %s2536_s29, %s2536_s29, %s2537_s16  }
  0xb8   : > { %s1775_s27 = sadd.s32 4294967294, %s2531_s22   ;;  %s2845_s3 = sadd.s32 1, %s2531_s22  }
  0xb9   : > { %s47_s4 = ssub.s32 %s2531_s22, %s2845_s3  ;;  %s50_s5 = sadd.s32 1, %s2527_s18 }
  0xba   : > { %p48_p8 = scmp.eq.s32.totalorder %s47_s4, 0  ;;  %p57_p1 = scmp.ne.s32.totalorder %s2527_s18, %s2523_s17 }
  0xbb   : > { %p58_p3 = scmp.eq.s32.totalorder %s2531_s22, 0  ;;  %p63_p13 = scmp.ne.s32.totalorder %s2523_s17, %s2519_s1 }
  0xbc   : > { %s2856_s12 = scalar_select %p48_p8, %s2527_s18, %s50_s5  }
  0xbd   : > { %p2858_p0 = por %p58_p3, %p57_p1  ;;  %p3186_p2 = scmp.eq.s32.totalorder %s2672_s2, 0 }
  0xbe   : > { %p465_p5 = scmp.eq.s32.totalorder %s2672_s2, 1  ;;  %p471_p7 = scmp.eq.s32.totalorder %s1775_s27, 1 }
  0xbf   : > { %p2864_p6 = por %p3186_p2, %p63_p13  ;;  %p2117_p9 = scmp.lt.s32.totalorder %s2531_s22, 2 }
  0xc0   : > { %s631_s16 = sand.u32 1, %s2527_s18   ;;  %p2871_p4 = por %p465_p5, %p57_p1 }
  0xc1   : > { %p2875_p10 = por %p471_p7, %p63_p13  ;;  %s1784_s21 = sshll.u32 %s631_s16, 3 }
  0xc2   : > { %s3188_s0 = scalar_select %p2871_p4, 1, 0 }
  0xc3   : > { %s3189_s20 = scalar_select %p2875_p10, 1, 0 }
  0xc4   : > { %s1785_s23 = sshll.u32 %s2531_s22, 7  ;;  %s3190_s30 = sld [smem:[#allocation23_spill]] }
  0xc5   : > { %s635_s15 = scalar_lea.vmem [#allocation2], %s1784_s21  ;;  %p2889_p11 = pnand %p2117_p9, %p2858_p0 }
  0xc6   : > { %s642_s27 = sshll.u32 %s635_s15, 4  ;;  %s632_s5 = scalar_lea.sflag [#allocation3], %s631_s16  ;;  %s2885_s27 = int_to_ptr.vmem [resolvable:$true] %s642_s27 }
  0xc7   : > { %p2393_p8 = pneg %p2889_p11 }
  0xca   : > { %s2883_s24 = scalar_lea.hbm %s3190_s30, %s1785_s23  ;;  %s2396_s19 = scalar_lea.hbm %s3190_s30, 256 }
  0xcb   : > { %s2391_s7 = scalar_lea.hbm %s2883_s24, 128  ;;  %p2397_p13 = scmp.lt.u32.totalorder %s2883_s24, %s3190_s30 }
  0xcc   : > { %p2392_p12 = scmp.ne.s32.totalorder %s2883_s24, %s2391_s7  ;;  %p2398_p0 = scmp.lt.u32.totalorder %s2396_s19, %s2391_s7 }
  0xcd   : > { %p2400_p5 = scmp.lt.u32.totalorder %s2391_s7, %s2883_s24 }
  0xce   : > { %p2394_p1 = pnand %p2393_p8, %p2392_p12  ;;  %p2399_p2 = por %p2398_p0, %p2397_p13 }
  0xd0   : > { %p2395_p3 = pneg %p2394_p1  ;;  %p2401_p7 = por %p2400_p5, %p2399_p2 }
  0xd2   : > { %p2402_p9 = pnand %p2401_p7, %p2395_p3 }
  0xd4   : > { %2405 = shalt.err (!%p2402_p9)
}
  0xd5   : > { %s2406_s16 = scalar_lea.vmem %s2885_s27, 128  ;;  %s2541_s15 = smov [#allocation2]  }
  0xd6   : > { %p2407_p12 = scmp.ne.s32.totalorder %s2885_s27, %s2406_s16  ;;  %s2411_s21 = sshll.u32 %s2541_s15, 4  ;;  %s2412_s21 = int_to_ptr.vmem [resolvable:$false] %s2411_s21 }
  0xd7   : > { %s2413_s23 = scalar_lea.vmem %s2412_s21, 256  ;;  %p2414_p4 = scmp.lt.s32.totalorder %s2885_s27, %s2412_s21 }
  0xd8   : > { %p2409_p1 = pnand %p2407_p12, %p2393_p8  ;;  %p2415_p13 = scmp.lt.s32.totalorder %s2413_s23, %s2406_s16 }
  0xda   : > { %p2410_p10 = pneg %p2409_p1  ;;  %p2416_p0 = por %p2415_p13, %p2414_p4 }
  0xdc   : > { %p2417_p2 = pnand %p2416_p0, %p2410_p10 }
  0xde   : > { %2420 = shalt.err (!%p2417_p2)
}
  0xdf   : > { %2103 = dma.hbm_to_vmem [thread:$0]  (!%p2889_p11), %s2883_s24, 128, %s2885_s27, %s632_s5  }
  0xe0   : > { %p3192_p3 = scmp.ne.s32.totalorder %s3178_s25, 0 }
  0xe1   : > { %s2921_s7 = sand.u32 (!%p3192_p3), 1, %s2523_s17  }
  0xe2   : > { %651 = sbr.rel (%p3192_p3) target bundleno = 2246 (0x8c6), region = 96  ;;  %s1787_s19 = sshll.u32 (!%p3192_p3), %s2921_s7, 3 }
  0xe3   : > { %s654_s14 = scalar_lea.sflag (!%p3192_p3), [#allocation3], %s2921_s7  ;;  %s2925_s26 = scalar_lea.vmem (!%p3192_p3), [#allocation2], %s1787_s19 }
  0xe9   : > { %2494 = dma.done.wait (%p2864_p6), %s654_s14, 128  }
  0xea   : > { %2496 = vsyncadd (%p2864_p6), %s654_s14, 4294967168  ;;  %p3193_p4 = scmp.eq.s32.totalorder %s2672_s2, 0 }
  0xec   : > { %2498 = dma.done.wait (%p3193_p4), [#allocation6], 2048   ;;  %p3194_p10 = pmov %p3193_p4 }
  0xed   : > { %p3195_p11 = pmov %p3193_p4 }
  0xee   : > { %2500 = vsyncadd (%p3194_p10), [#allocation6], 4294965248 }
  0xef   : > { %2502 = dma.done.wait (%p3195_p11), [#allocation9], 2048   ;;  %p3196_p8 = pmov %p3193_p4 }
  0xf0   : > { %p3197_p5 = pmov %p3193_p4 }
  0xf1   : > { %2504 = vsyncadd (%p3196_p8), [#allocation9], 4294965248 }
  0xf2   : > { %2506 = dma.done.wait (%p3197_p5), [#allocation12], 2048   ;;  %p3198_p7 = pmov %p3193_p4 }
  0xf3   : > { %v2542_v0 = vmov 0.0   ;;  %vm2543_vm0 = vmmov 0   ;;  %v2167_v1 = vld [vmem:[#allocation7] sm:$0xff]   ;;  %v2169_v3 = vld [vmem:[#allocation7 + $0x8] sm:$0xff]   ;;  %v2171_v5 = vld [vmem:[#allocation7 + $0x10] sm:$0xff]   ;;  %s3199_s24 = sld [smem:[#allocation27_spill]] }
  0xf4   : > { %2508 = vsyncadd (%p3198_p7), [#allocation12], 4294965248  ;;  %1939 = vmatprep.subr.bf16.mxu1 %v2542_v0  ;;  %1919 = vmatprep.subr.bf16.mxu0 %v2542_v0  ;;  %v2168_v2 = vld [vmem:[#allocation5] sm:$0xff]   ;;  %v2170_v4 = vld [vmem:[#allocation5 + $0x8] sm:$0xff]   ;;  %s3200_s5 = sld [smem:[#allocation25_spill]]  ;;  %s3201_s6 = sld [smem:[#allocation29_spill]] }
  0xf5   : > { %1955 = vmatprep.mubr.msk.bf16.mxu1 %vm2543_vm0, %v2542_v0  ;;  %1935 = vmatprep.mubr.msk.bf16.mxu0 %vm2543_vm0, %v2542_v0  ;;  %v2172_v6 = vld [vmem:[#allocation5 + $0x10] sm:$0xff]   ;;  %v2173_v7 = vld [vmem:[#allocation7 + $0x18] sm:$0xff]   ;;  %v2175_v9 = vld [vmem:[#allocation7 + $0x20] sm:$0xff]   ;;  %vm1141_vm1 = vcmask 1043456   ;;  %vm1123_vm2 = vcmask 64512   ;;  %s1794_s21 = sshll.u32 %s2921_s7, 2 }
  0xf6   : > { %1940 = vmatpush3.bf16.msra.mxu1 %v2167_v1  ;;  %1920 = vmatpush3.bf16.msra.mxu0 %v2168_v2  ;;  %v2174_v8 = vld [vmem:[#allocation5 + $0x18] sm:$0xff]   ;;  %v2176_v10 = vld [vmem:[#allocation5 + $0x20] sm:$0xff]   ;;  %v2177_v11 = vld [vmem:[#allocation7 + $0x28] sm:$0xff]   ;;  %vm1136_vm3 = vcmask 60416   ;;  %s3003_s23 = scalar_lea.vmem [#allocation15], %s1794_s21  ;;  %s3202_s8 = sld [smem:[#allocation31_spill]] }
  0xf7   : > { %1941 = vmatprep.subr.bf16.mxu1 %v2542_v0  ;;  %1921 = vmatprep.subr.bf16.mxu0 %v2542_v0  ;;  %v2178_v12 = vld [vmem:[#allocation5 + $0x28] sm:$0xff]   ;;  %v2179_v13 = vld [vmem:[#allocation7 + $0x30] sm:$0xff]   ;;  %v2181_v15 = vld [vmem:[#allocation7 + $0x38] sm:$0xff]   ;;  %s3204_s19 = sld [smem:[#allocation33_spill]]  ;;  %s3162_s14 = sshll.u32 %s2672_s2, 6 }
  0xf8   : > { %v2180_v14 = vld [vmem:[#allocation5 + $0x30] sm:$0xff]   ;;  %v2182_v17 = vld [vmem:[#allocation5 + $0x38] sm:$0xff]   ;;  %v2183_v19 = vld [vmem:[#allocation8] sm:$0xff]   ;;  %s3205_s29 = sld [smem:[#allocation37_spill]]  ;;  %s1616_s27 = sshll.u32 %s3003_s23, 4  ;;  %s1617_s27 = int_to_ptr.vmem [resolvable:$true] %s1616_s27 }
  0xf9   : > { %v2962_v16 = vld [vmem:[%s2925_s26] sm:$0xff]  ;;  %v2184_v20 = vld [vmem:[#allocation8 + $0x8] sm:$0xff]   ;;  %v2187_v23 = vld [vmem:[#allocation8 + $0x20] sm:$0xff]   ;;  %s1590_s4 = scalar_lea.sflag [#allocation16], %s2921_s7  ;;  %p3206_p9 = scmp.ne.s32.totalorder %s3188_s0, 0 }
  0xfa   : > { %1942 = vmatpush3.bf16.msra.mxu1 %v2169_v3  ;;  %1922 = vmatpush3.bf16.msra.mxu0 %v2170_v4  ;;  %v745_v18 = vpack.c.bf16 %v2962_v16, %v2962_v16  ;;  %v2185_v21 = vld [vmem:[#allocation8 + $0x10] sm:$0xff]   ;;  %v2186_v22 = vld [vmem:[#allocation8 + $0x18] sm:$0xff]   ;;  %v2188_v24 = vld [vmem:[#allocation8 + $0x28] sm:$0xff]   ;;  %s2544_s16 = smov [#allocation15]  }
  0xfb   : > { %1943 = vmatprep.subr.bf16.mxu1 %v2542_v0  ;;  %1923 = vmatprep.subr.bf16.mxu0 %v2542_v0  ;;  %v2189_v25 = vld [vmem:[#allocation8 + $0x30] sm:$0xff]   ;;  %v2190_v26 = vld [vmem:[#allocation8 + $0x38] sm:$0xff]   ;;  %v2191_v63 = vld [vmem:[#allocation10] sm:$0xff]   ;;  %s2425_s15 = sshll.u32 %s2544_s16, 4  ;;  %s2426_s15 = int_to_ptr.vmem [resolvable:$false] %s2425_s15 }
  0xfc   : > { %v1805_v27 = vld [vmem:[%s3199_s24] ss:$0 sm:$0xff]  ;;  %v2192_v2 = vld [vmem:[#allocation10 + $0x8] sm:$0xff]   ;;  %v2194_v4 = vld [vmem:[#allocation10 + $0x18] sm:$0xff]   ;;  %p2428_p13 = scmp.lt.s32.totalorder %s1617_s27, %s2426_s15 }
  0xfd   : > { %v1796_v28 = vld [vmem:[%s3200_s5] ss:$0 sm:$0xff]  ;;  %s3203_s5 = sld [smem:[#allocation32_spill]] }
  0xfe   : > { %1944 = vmatpush3.bf16.msra.mxu1 %v2171_v5  ;;  %1924 = vmatpush3.bf16.msra.mxu0 %v2172_v6  ;;  %v1814_v42 = vld [vmem:[%s3201_s6] ss:$0 sm:$0xff]  ;;  %v2195_v5 = vld [vmem:[#allocation10 + $0x20] sm:$0xff]   ;;  %v2196_v6 = vld [vmem:[#allocation10 + $0x28] sm:$0xff]   ;;  %s3054_s24 = scalar_lea.hbm %s3205_s29, %s3162_s14 }
  0xff   : > { %1945 = vmatprep.subr.bf16.mxu1 %v2542_v0  ;;  %1925 = vmatprep.subr.bf16.mxu0 %v2542_v0  ;;  %v2193_v3 = vld [vmem:[#allocation10 + $0x10] sm:$0xff]  }
 0x102   : > { %1946 = vmatpush3.bf16.msra.mxu1 %v2173_v7  ;;  %1926 = vmatpush3.bf16.msra.mxu0 %v2174_v8  ;;  %v2197_v7 = vld [vmem:[#allocation10 + $0x30] sm:$0xff]   ;;  %v2198_v8 = vld [vmem:[#allocation10 + $0x38] sm:$0xff]  }
 0x103   : > { %1947 = vmatprep.subr.bf16.mxu1 %v2542_v0  ;;  %1927 = vmatprep.subr.bf16.mxu0 %v2542_v0 }
 0x106   : > { %1948 = vmatpush3.bf16.msra.mxu1 %v2175_v9  ;;  %1928 = vmatpush3.bf16.msra.mxu0 %v2176_v10 }
 0x107   : > { %1949 = vmatprep.subr.bf16.mxu1 %v2542_v0  ;;  %1929 = vmatprep.subr.bf16.mxu0 %v2542_v0 }
 0x10a   : > { %1950 = vmatpush3.bf16.msra.mxu1 %v2177_v11  ;;  %1930 = vmatpush3.bf16.msra.mxu0 %v2178_v12 }
 0x10b   : > { %1951 = vmatprep.subr.bf16.mxu1 %v2542_v0  ;;  %1931 = vmatprep.subr.bf16.mxu0 %v2542_v0 }
 0x10e   : > { %1952 = vmatpush3.bf16.msra.mxu1 %v2179_v13  ;;  %1932 = vmatpush3.bf16.msra.mxu0 %v2180_v14  ;;  %v2199_v14 = vld [vmem:[#allocation11] sm:$0xff]  }
 0x10f   : > { %1953 = vmatprep.subr.bf16.mxu1 %v2542_v0  ;;  %1933 = vmatprep.subr.bf16.mxu0 %v2542_v0 }
 0x112   : > { %1954 = vmatpush3.bf16.msra.mxu1 %v2181_v15  ;;  %1934 = vmatpush3.bf16.msra.mxu0 %v2182_v17  ;;  %v1824_v15 = vld [vmem:[%s3202_s8] ss:$0 sm:$0xff] }
 0x113   : > { %1985 = vmatprep.subr.bf16.mxu1 %v2542_v0  ;;  %1959 = vmatprep.subr.bf16.mxu0 %v2542_v0 }
 0x115   : > { %1956 = vmatmul.mubr.bf16.vlgmr.msra.gmra.mrb[0].mxu1 %v745_v18  ;;  %1936 = vmatmul.mubr.bf16.vlgmr.msra.gmra.mrb[0].mxu0 %v745_v18 }
 0x116   : > { %1987 = vmatprep.mubr.msk.bf16.mxu1 %vm2543_vm0, %v2542_v0  ;;  %1960 = vmatpush3.bf16.msra.mxu0 %v2183_v19 }
 0x117   : > { %1975 = vmatprep.mubr.msk.bf16.mxu0 %vm2543_vm0, %v2542_v0  ;;  %1961 = vmatprep.subr.bf16.mxu0 %v2542_v0 }
 0x11a   : > { %1962 = vmatpush3.bf16.msra.mxu0 %v2184_v20 }
 0x11b   : > { %1963 = vmatprep.subr.bf16.mxu0 %v2542_v0 }
 0x11e   : > { %1964 = vmatpush3.bf16.msra.mxu0 %v2185_v21 }
 0x11f   : > { %1965 = vmatprep.subr.bf16.mxu0 %v2542_v0 }
 0x122   : > { %1966 = vmatpush3.bf16.msra.mxu0 %v2186_v22 }
 0x123   : > { %1967 = vmatprep.subr.bf16.mxu0 %v2542_v0 }
 0x126   : > { %1968 = vmatpush3.bf16.msra.mxu0 %v2187_v23 }
 0x127   : > { %1969 = vmatprep.subr.bf16.mxu0 %v2542_v0 }
 0x12a   : > { %1970 = vmatpush3.bf16.msra.mxu0 %v2188_v24  ;;  %v2200_v24 = vld [vmem:[#allocation11 + $0x8] sm:$0xff]  }
 0x12b   : > { %1971 = vmatprep.subr.bf16.mxu0 %v2542_v0 }
 0x12e   : > { %1972 = vmatpush3.bf16.msra.mxu0 %v2189_v25  ;;  %v2201_v25 = vld [vmem:[#allocation11 + $0x10] sm:$0xff]  }
 0x12f   : > { %1973 = vmatprep.subr.bf16.mxu0 %v2542_v0 }
 0x132   : > { %1974 = vmatpush3.bf16.msra.mxu0 %v2190_v26  ;;  %v2202_v26 = vld [vmem:[#allocation11 + $0x18] sm:$0xff]  }
 0x133   : > { %1979 = vmatprep.subr.bf16.mxu0 %v2542_v0 }
 0x135   : > { %1976 = vmatmul.mubr.bf16.vlgmr.msra.gmra.mrb[4].mxu0 %v745_v18 }
 0x136   : > { %1981 = vmatprep.mubr.msk.bf16.mxu0 %vm2543_vm0, %v2542_v0 }
 0x1e8   : > { %v962_v29 = vpop.f32.mrb[0].mxu1  ;;  %v851_v32 = vpop.f32.mrb[0].mxu0 }
 0x1e9   : > { %v963_v30 = vadd.f32 %v1805_v27, %v962_v29  ;;  %v1957_v31 = vpop.f32.mrb[1].mxu1  ;;  %v852_v34 = vadd.f32 %v1796_v28, %v851_v32  ;;  %v1937_v35 = vpop.f32.mrb[1].mxu0  ;;  %v2203_v27 = vld [vmem:[#allocation11 + $0x20] sm:$0xff]   ;;  %v2204_v28 = vld [vmem:[#allocation11 + $0x28] sm:$0xff]   ;;  %v2206_v29 = vld [vmem:[#allocation11 + $0x38] sm:$0xff]  }
 0x1ea   : > { %v965_v33 = vpop.f32.mrb[2].mxu1  ;;  %v854_v38 = vpop.f32.mrb[2].mxu0  ;;  %v2208_v31 = vld [vmem:[#allocation13 + $0x8] sm:$0xff]   ;;  %v2209_v32 = vld [vmem:[#allocation13 + $0x10] sm:$0xff]  }
 0x1eb   : > { %v1081_v36 = vpack.c.bf16 %v963_v30, %v963_v30  ;;  %v1958_v37 = vpop.f32.mrb[3].mxu1  ;;  %v1079_v39 = vmul.f32 0.17677669, %v852_v34  ;;  %v1938_v40 = vpop.f32.mrb[3].mxu0  ;;  %v2207_v30 = vld [vmem:[#allocation13] sm:$0xff]   ;;  %v2210_v33 = vld [vmem:[#allocation13 + $0x18] sm:$0xff]  }
 0x1ec   : > { %v2211_v34 = vld [vmem:[#allocation13 + $0x20] sm:$0xff]   ;;  %v2212_v35 = vld [vmem:[#allocation13 + $0x28] sm:$0xff]  }
 0x1ed   : > { %1980 = vmatpush3.bf16.xpose.msra.mxu0 %v1081_v36  ;;  %v1080_v41 = vpack.c.bf16 %v1079_v39, %v1079_v39 }
 0x1ee   : > { %2011 = vmatprep.subr.bf16.mxu0 %v2542_v0 }
 0x1f4   : > { %1982 = vmatmul.mubr.bf16.vlgmr.msra.gmra.mrb[8].mxu0 %v1080_v41 }
 0x1f5   : > { %2027 = vmatprep.mubr.msk.bf16.mxu0 %vm2543_vm0, %v2542_v0  ;;  %2012 = vmatpush3.bf16.msra.mxu0 %v2199_v14 }
 0x1f6   : > { %2013 = vmatprep.subr.bf16.mxu0 %v2542_v0 }
 0x1f9   : > { %2014 = vmatpush3.bf16.msra.mxu0 %v2200_v24 }
 0x1fa   : > { %2015 = vmatprep.subr.bf16.mxu0 %v2542_v0 }
 0x1fd   : > { %2016 = vmatpush3.bf16.msra.mxu0 %v2201_v25 }
 0x1fe   : > { %2017 = vmatprep.subr.bf16.mxu0 %v2542_v0 }
 0x201   : > { %2018 = vmatpush3.bf16.msra.mxu0 %v2202_v26 }
 0x202   : > { %2019 = vmatprep.subr.bf16.mxu0 %v2542_v0 }
 0x205   : > { %2020 = vmatpush3.bf16.msra.mxu0 %v2203_v27 }
 0x206   : > { %2021 = vmatprep.subr.bf16.mxu0 %v2542_v0 }
 0x208   : > { %v1073_v43 = vpop.f32.mrb[4].mxu0 }
 0x209   : > { %v1074_v44 = vadd.f32 %v1814_v42, %v1073_v43  ;;  %v1977_v45 = vpop.f32.mrb[5].mxu0  ;;  %2022 = vmatpush3.bf16.msra.mxu0 %v2204_v28 }
 0x20a   : > { %v1076_v46 = vpop.f32.mrb[6].mxu0  ;;  %2023 = vmatprep.subr.bf16.mxu0 %v2542_v0  ;;  %v1833_v45 = vld [vmem:[%s3141_s9] ss:$0 sm:$0xff] }
 0x20b   : > { %v1082_v47 = vpack.c.bf16 %v1074_v44, %v1074_v44  ;;  %v1978_v48 = vpop.f32.mrb[7].mxu0 }
 0x20d   : > { %v1143_v49 = vsel %vm1141_vm1, %v1082_v47, 0  ;;  %v1834_v47 = vld [vmem:[%s3142_s10] ss:$0 sm:$0xff] }
 0x20e   : > { %1986 = vmatpush3.bf16.msra.mxu1 %v1143_v49 }
 0x20f   : > { %1991 = vmatprep.subr.bf16.mxu1 %v2542_v0 }
 0x2c7   : > { %v1117_v50 = vpop.f32.mrb[8].mxu0 }
 0x2c8   : > { %v1983_v51 = vpop.f32.mrb[9].mxu0  ;;  %v1124_v52 = vsel %vm1123_vm2, %v1117_v50, -inf }
 0x2c9   : > { %1125 = vmax.xlane.f32.xlu0 %v1124_v52  ;;  %v1120_v53 = vpop.f32.mrb[10].mxu0  ;;  %v2213_v51 = vld [vmem:[#allocation13 + $0x30] sm:$0xff]   ;;  %v2214_v52 = vld [vmem:[#allocation13 + $0x38] sm:$0xff]  }
 0x2ca   : > { %v1984_v54 = vpop.f32.mrb[11].mxu0  ;;  %v1835_v53 = vld [vmem:[%s3203_s5] ss:$0 sm:$0xff]  ;;  %s2421_s5 = scalar_lea.vmem %s1617_s27, 64 }
 0x2cb   : > { %p2422_p6 = scmp.ne.s32.totalorder %s1617_s27, %s2421_s5 }
 0x2cd   : > { %p2423_p12 = pnand %p2422_p6, %p3206_p9 }
 0x2cf   : > { %p2424_p1 = pneg %p2423_p12 }
 0x356   : > { %v1126_v55 = vpop.xlane.xlu0 %1125 }
 0x357   : > { %v1127_v56 = vsub.f32 %v1117_v50, %v1126_v55 }
 0x359   : > { %v1128_v57 = vmul.f32 1.442695, %v1127_v56 }
 0x35b   : > { %2215 = vpow2.f32 %v1128_v57 }
 0x365   : > { %v2216_v58 = vpop.eup %2215 }
 0x366   : > { %v1130_v59 = vsel %vm1123_vm2, %v2216_v58, 0.0 }
 0x367   : > { %1131 = vadd.xlane.f32.xlu0 %v1130_v59 }
 0x3f4   : > { %v1132_v60 = vpop.xlane.xlu0 %1131 }
 0x3f5   : > { %2217 = vrcp.f32 %v1132_v60 }
 0x3ff   : > { %v2218_v61 = vpop.eup %2217 }
 0x400   : > { %v1134_v62 = vmul.f32 %v2218_v61, %v2216_v58 }
 0x402   : > { %v1135_v1 = vpack.c.bf16 %v1134_v62, %v1134_v62 }
 0x404   : > { %1988 = vmatmul.mubr.msk.bf16.vlgmr.msra.gmra.mrb[4].mxu1 %vm1123_vm2, %v1135_v1  ;;  %1137 = vst.msk [vmem:[%s3003_s23] sm:$0xf] %vm1136_vm3, %v1135_v1 }
 0x405   : > { %1992 = vmatpush3.bf16.msra.mxu1 %v2191_v63  ;;  %2007 = vmatprep.mubr.msk.bf16.mxu1 %vm2543_vm0, %v2542_v0 }
 0x406   : > { %1993 = vmatprep.subr.bf16.mxu1 %v2542_v0 }
 0x409   : > { %1994 = vmatpush3.bf16.msra.mxu1 %v2192_v2 }
 0x40a   : > { %1995 = vmatprep.subr.bf16.mxu1 %v2542_v0 }
 0x40d   : > { %1996 = vmatpush3.bf16.msra.mxu1 %v2193_v3 }
 0x40e   : > { %1997 = vmatprep.subr.bf16.mxu1 %v2542_v0 }
 0x411   : > { %1998 = vmatpush3.bf16.msra.mxu1 %v2194_v4 }
 0x412   : > { %1999 = vmatprep.subr.bf16.mxu1 %v2542_v0 }
 0x415   : > { %2000 = vmatpush3.bf16.msra.mxu1 %v2195_v5 }
 0x416   : > { %2001 = vmatprep.subr.bf16.mxu1 %v2542_v0 }
 0x419   : > { %2002 = vmatpush3.bf16.msra.mxu1 %v2196_v6 }
 0x41a   : > { %2003 = vmatprep.subr.bf16.mxu1 %v2542_v0 }
 0x41d   : > { %2004 = vmatpush3.bf16.msra.mxu1 %v2197_v7 }
 0x41e   : > { %2005 = vmatprep.subr.bf16.mxu1 %v2542_v0 }
 0x421   : > { %2006 = vmatpush3.bf16.msra.mxu1 %v2198_v8 }
 0x422   : > { %2031 = vmatprep.subr.bf16.mxu1 %v2542_v0 }
 0x4d7   : > { %v1179_v9 = vpop.f32.mrb[4].mxu1 }
 0x4d8   : > { %v1185_v10 = vpack.c.bf16 %v1179_v9, %v1179_v9  ;;  %v1989_v11 = vpop.f32.mrb[5].mxu1 }
 0x4d9   : > { %v1182_v12 = vpop.f32.mrb[6].mxu1 }
 0x4da   : > { %v1990_v13 = vpop.f32.mrb[7].mxu1  ;;  %2008 = vmatmul.mubr.bf16.vlgmr.msra.gmra.mrb[8].mxu1 %v1185_v10 }
 0x4db   : > { %2047 = vmatprep.mubr.msk.bf16.mxu1 %vm2543_vm0, %v2542_v0  ;;  %2032 = vmatpush3.bf16.msra.mxu1 %v2207_v30 }
 0x4dc   : > { %2033 = vmatprep.subr.bf16.mxu1 %v2542_v0 }
 0x4df   : > { %2034 = vmatpush3.bf16.msra.mxu1 %v2208_v31 }
 0x4e0   : > { %2035 = vmatprep.subr.bf16.mxu1 %v2542_v0 }
 0x4e3   : > { %2036 = vmatpush3.bf16.msra.mxu1 %v2209_v32 }
 0x4e4   : > { %2037 = vmatprep.subr.bf16.mxu1 %v2542_v0 }
 0x4e7   : > { %2038 = vmatpush3.bf16.msra.mxu1 %v2210_v33 }
 0x4e8   : > { %2039 = vmatprep.subr.bf16.mxu1 %v2542_v0 }
 0x4eb   : > { %2040 = vmatpush3.bf16.msra.mxu1 %v2211_v34 }
 0x4ec   : > { %2041 = vmatprep.subr.bf16.mxu1 %v2542_v0 }
 0x4ef   : > { %2042 = vmatpush3.bf16.msra.mxu1 %v2212_v35 }
 0x4f0   : > { %2043 = vmatprep.subr.bf16.mxu1 %v2542_v0 }
 0x4f3   : > { %2044 = vmatpush3.bf16.msra.mxu1 %v2213_v51 }
 0x4f4   : > { %2045 = vmatprep.subr.bf16.mxu1 %v2542_v0 }
 0x4f7   : > { %2046 = vmatpush3.bf16.msra.mxu1 %v2214_v52 }
 0x5ad   : > { %v1291_v17 = vpop.f32.mrb[8].mxu1 }
 0x5ae   : > { %v1292_v18 = vadd.f32 %v1824_v15, %v1291_v17  ;;  %v2009_v19 = vpop.f32.mrb[9].mxu1 }
 0x5af   : > { %v1294_v20 = vpop.f32.mrb[10].mxu1 }
 0x5b0   : > { %v1297_v21 = vadd.f32 %v1292_v18, %v2962_v16  ;;  %v2010_v22 = vpop.f32.mrb[11].mxu1  ;;  %v2205_v16 = vld [vmem:[#allocation11 + $0x30] sm:$0xff]  }
 0x5b1   : > { %2024 = vmatpush3.bf16.msra.mxu0 %v2205_v16 }
 0x5b2   : > { %1300 = vadd.xlane.f32.xlu1 %v1297_v21  ;;  %v1302_v23 = vmul.f32 %v1297_v21, %v1297_v21  ;;  %2025 = vmatprep.subr.bf16.mxu0 %v2542_v0  ;;  %v1844_v0 = vld [vmem:[%s3204_s19] ss:$0 sm:$0xff]  ;;  %s2427_s19 = scalar_lea.vmem %s2426_s15, 128 }
 0x5b3   : > { %p2429_p0 = scmp.lt.s32.totalorder %s2427_s19, %s2421_s5 }
 0x5b5   : > { %2026 = vmatpush3.bf16.msra.mxu0 %v2206_v29  ;;  %p2430_p2 = por %p2429_p0, %p2428_p13 }
 0x5b6   : > { %1303 = vadd.xlane.f32.xlu1 %v1302_v23 }
 0x5b7   : > { %p2431_p3 = pnand %p2430_p2, %p2424_p1 }
 0x63f   : > { %v1301_v36 = vpop.xlane.xlu1 %1300 }
 0x640   : > { %v1305_v37 = vmul.f32 0.03125, %v1301_v36 }
 0x642   : > { %v1307_v39 = vmul.f32 %v1305_v37, %v1305_v37  ;;  %v1311_v43 = vsub.f32 %v1297_v21, %v1305_v37 }
 0x643   : > { %v1304_v38 = vpop.xlane.xlu1 %1303 }
 0x644   : > { %v1306_v40 = vmul.f32 0.03125, %v1304_v38 }
 0x646   : > { %v1308_v41 = vsub.f32 %v1306_v40, %v1307_v39 }
 0x648   : > { %v1309_v42 = vadd.f32 1e-05, %v1308_v41 }
 0x64a   : > { %2219 = vrsqrt.f32 %v1309_v42 }
 0x654   : > { %v2220_v44 = vpop.eup %2219 }
 0x655   : > { %v1312_v46 = vmul.f32 %v2220_v44, %v1311_v43 }
 0x657   : > { %v1319_v48 = vmul.f32 %v1833_v45, %v1312_v46 }
 0x659   : > { %v1326_v49 = vadd.f32 %v1834_v47, %v1319_v48 }
 0x65b   : > { %v1327_v50 = vpack.c.bf16 %v1326_v49, %v1326_v49 }
 0x65d   : > { %2028 = vmatmul.mubr.bf16.vlgmr.msra.gmra.mrb[12].mxu0 %v1327_v50 }
 0x730   : > { %v1433_v54 = vpop.f32.mrb[12].mxu0 }
 0x731   : > { %v1434_v55 = vadd.f32 %v1835_v53, %v1433_v54  ;;  %v2029_v56 = vpop.f32.mrb[13].mxu0 }
 0x732   : > { %v1436_v57 = vpop.f32.mrb[14].mxu0 }
 0x733   : > { %v1439_v58 = vmax.f32 %v1434_v55, 0.0  ;;  %v2030_v59 = vpop.f32.mrb[15].mxu0 }
 0x735   : > { %v1440_v60 = vpack.c.bf16 %v1439_v58, %v1439_v58 }
 0x737   : > { %2048 = vmatmul.mubr.bf16.vlgmr.msra.gmra.mrb[12].mxu1 %v1440_v60 }
 0x80a   : > { %v1546_v61 = vpop.f32.mrb[12].mxu1 }
 0x80b   : > { %v1547_v62 = vadd.f32 %v1844_v0, %v1546_v61  ;;  %v2049_v63 = vpop.f32.mrb[13].mxu1 }
 0x80c   : > { %v1549_v1 = vpop.f32.mrb[14].mxu1 }
 0x80d   : > { %v1552_v2 = vadd.f32 %v1547_v62, %v1326_v49  ;;  %v2050_v3 = vpop.f32.mrb[15].mxu1 }
 0x80f   : > { %1555 = vadd.xlane.f32.xlu0 %v1552_v2  ;;  %v1557_v4 = vmul.f32 %v1552_v2, %v1552_v2 }
 0x811   : > { %1558 = vadd.xlane.f32.xlu1 %v1557_v4 }
 0x812   : > { %2434 = shalt.err (!%p2431_p3)
}
 0x813   : > { %s2435_s23 = scalar_lea.hbm %s3054_s24, 64  ;;  %s2439_s16 = scalar_lea.hbm %s3205_s29, 128 }
 0x814   : > { %p2436_p4 = scmp.ne.s32.totalorder %s3054_s24, %s2435_s23  ;;  %p2440_p8 = scmp.lt.u32.totalorder %s3054_s24, %s3205_s29 }
 0x815   : > { %p2441_p5 = scmp.lt.u32.totalorder %s2439_s16, %s2435_s23  ;;  %p2443_p6 = scmp.lt.u32.totalorder %s2435_s23, %s3054_s24 }
 0x816   : > { %p2437_p10 = pnand %p2436_p4, %p3206_p9 }
 0x817   : > { %p2442_p7 = por %p2441_p5, %p2440_p8 }
 0x818   : > { %p2438_p11 = pneg %p2437_p10 }
 0x819   : > { %p2444_p12 = por %p2443_p6, %p2442_p7 }
 0x81b   : > { %p2445_p1 = pnand %p2444_p12, %p2438_p11 }
 0x81d   : > { %2448 = shalt.err (!%p2445_p1)
}
 0x81e   : > { %2078 = dma.vmem_to_hbm [thread:$0]  (%p3206_p9), %s1617_s27, 64, %s3054_s24, %s1590_s4  }
 0x81f   : > { %s3207_s19 = sld [smem:[#allocation34_spill]]  ;;  %s3208_s27 = sld [smem:[#allocation35_spill]] }
 0x820   : > { %s735_s4 = scalar_lea.vmem [#allocation14], %s1794_s21  ;;  %s3209_s25 = sshll.u32 %s2672_s2, 6 }
 0x821   : > { %s1603_s26 = sshll.u32 %s735_s4, 4  ;;  %s3210_s6 = sld [smem:[#allocation36_spill]]  ;;  %s3090_s26 = int_to_ptr.vmem [resolvable:$true] %s1603_s26 }
 0x822   : > { %s1585_s14 = scalar_lea.sflag [#allocation4], %s2921_s7  ;;  %s2449_s5 = scalar_lea.vmem %s3090_s26, 64 }
 0x823   : > { %p2450_p13 = scmp.ne.s32.totalorder %s3090_s26, %s2449_s5  ;;  %s2545_s21 = smov [#allocation14]  }
 0x825   : > { %v1853_v14 = vld [vmem:[%s3207_s19] ss:$0 sm:$0xff]  ;;  %p2451_p0 = pnand %p2450_p13, %p3206_p9  ;;  %s2453_s19 = sshll.u32 %s2545_s21, 4  ;;  %s2454_s19 = int_to_ptr.vmem [resolvable:$false] %s2453_s19 }
 0x826   : > { %v1854_v17 = vld [vmem:[%s3208_s27] ss:$0 sm:$0xff]  ;;  %s2455_s2 = scalar_lea.vmem %s2454_s19, 128  ;;  %p2456_p3 = scmp.lt.s32.totalorder %s3090_s26, %s2454_s19 }
 0x827   : > { %s3088_s8 = scalar_lea.hbm %s3210_s6, %s3209_s25  ;;  %p2452_p2 = pneg %p2451_p0 }
 0x828   : > { %p2457_p4 = scmp.lt.s32.totalorder %s2455_s2, %s2449_s5 }
 0x82a   : > { %p2458_p10 = por %p2457_p4, %p2456_p3 }
 0x82c   : > { %p2459_p11 = pnand %p2458_p10, %p2452_p2 }
 0x89c   : > { %v1556_v5 = vpop.xlane.xlu0 %1555 }
 0x89d   : > { %v1560_v6 = vmul.f32 0.03125, %v1556_v5 }
 0x89e   : > { %v1559_v7 = vpop.xlane.xlu1 %1558 }
 0x89f   : > { %v1562_v8 = vmul.f32 %v1560_v6, %v1560_v6  ;;  %v1561_v9 = vmul.f32 0.03125, %v1559_v7  ;;  %v1566_v12 = vsub.f32 %v1552_v2, %v1560_v6 }
 0x8a1   : > { %v1563_v10 = vsub.f32 %v1561_v9, %v1562_v8 }
 0x8a3   : > { %v1564_v11 = vadd.f32 1e-05, %v1563_v10 }
 0x8a5   : > { %2221 = vrsqrt.f32 %v1564_v11 }
 0x8af   : > { %v2222_v13 = vpop.eup %2221 }
 0x8b0   : > { %v1567_v15 = vmul.f32 %v2222_v13, %v1566_v12 }
 0x8b2   : > { %v1574_v18 = vmul.f32 %v1853_v14, %v1567_v15 }
 0x8b4   : > { %v1581_v19 = vadd.f32 %v1854_v17, %v1574_v18 }
 0x8b6   : > { %v1582_v20 = vpack.c.bf16 %v1581_v19, %v1581_v19 }
 0x8b8   : > { %1583 = vst [vmem:[%s735_s4] sm:$0xf] %v1582_v20 }
 0x8b9   : > { %2462 = shalt.err (!%p2459_p11)
}
 0x8ba   : > { %s2463_s7 = scalar_lea.hbm %s3088_s8, 64  ;;  %s2467_s27 = scalar_lea.hbm %s3210_s6, 128 }
 0x8bb   : > { %p2464_p8 = scmp.ne.s32.totalorder %s3088_s8, %s2463_s7  ;;  %p2468_p6 = scmp.lt.u32.totalorder %s3088_s8, %s3210_s6 }
 0x8bc   : > { %p2469_p12 = scmp.lt.u32.totalorder %s2467_s27, %s2463_s7  ;;  %p2471_p13 = scmp.lt.u32.totalorder %s2463_s7, %s3088_s8 }
 0x8bd   : > { %p2465_p5 = pnand %p2464_p8, %p3206_p9 }
 0x8be   : > { %p2470_p1 = por %p2469_p12, %p2468_p6 }
 0x8bf   : > { %p2466_p7 = pneg %p2465_p5 }
 0x8c0   : > { %p2472_p0 = por %p2471_p13, %p2470_p1 }
 0x8c2   : > { %p2473_p2 = pnand %p2472_p0, %p2466_p7 }
 0x8c4   : > { %2476 = shalt.err (!%p2473_p2)
}
 0x8c5   : > { %2077 = dma.vmem_to_hbm [thread:$0]  (%p3206_p9), %s3090_s26, 64, %s3088_s8, %s1585_s14  }
 0x8c6 PF: > { %s1628_s16 = sand.u32 1, %s2519_s1   ;;  %p3211_p3 = scmp.ne.s32.totalorder %s3189_s20, 0 }
 0x8c7   : > { %p3212_p4 = scmp.ge.s32.totalorder %s2531_s22, 2  ;;  %s1629_s15 = scalar_lea.sflag [#allocation4], %s1628_s16 }
 0x8c9   : > { %p2105_p10 = pnand %p3212_p4, %p3211_p3 }
 0x8cb   : > { %2510 = dma.done.wait (!%p2105_p10), %s1629_s15, 64  }
 0x8cc   : > { %2512 = vsyncadd (!%p2105_p10), %s1629_s15, 4294967232  ;;  %s1638_s5 = scalar_lea.sflag [#allocation16], %s1628_s16 }
 0x8cd   : > { %2514 = dma.done.wait (!%p2105_p10), %s1638_s5, 64  }
 0x8ce   : > { %2516 = vsyncadd (!%p2105_p10), %s1638_s5, 4294967232  ;;  %p40_p9 = scmp.ge.s32.totalorder %s2845_s3, 4   ;;  %s3213_s1 = smov %s2523_s17 }
 0x8cf   : > { %s3214_s17 = smov %s2527_s18  ;;  %s3215_s18 = smov %s2856_s12 }
 0x8d0   : > { %s3216_s22 = smov %s2845_s3  ;;  %42 = sbr.rel (!%p40_p9) target bundleno = 26 (0x1a), region = 182 }
 0x8d7   :  { %1643 = vsyncpa [#allocation3], 1 }
 0x8d8   :  { %1645 = vsyncpa [#allocation3 + $0x1], 1 }
 0x8d9   :  { %1646 = vsyncpa [#allocation6], 1 }
 0x8da   :  { %1647 = vsyncpa [#allocation9], 1 }
 0x8db   :  { %1648 = vsyncpa [#allocation12], 1 }
 0x8dc   :  { %1649 = vsyncpa [#allocation4], 1 }
 0x8dd   :  { %1651 = vsyncpa [#allocation4 + $0x1], 1 }
 0x8de   :  { %1652 = vsyncpa [#allocation16], 1 }
 0x8df   :  { %1654 = vsyncpa [#allocation16 + $0x1], 1 }

// kernel: tpu_custom_call.1
= control target key start
LH: loop header
LB: loop body
LE: loop exit
PB: predicated region body
PF: predicated region fallthrough
CT: control target
= control target key end

     0   :  { %s3132_s0 = inlined_call_operand.hbm [shape: f32[2,8,128], index: 0, kind: input, shape index: {}]   ;;  %s3133_s1 = inlined_call_operand.hbm [shape: bf16[128,128], index: 1, kind: input, shape index: {}]   ;;  %s3134_s2 = inlined_call_operand.vmem [shape: f32[1,128], index: 2, kind: input, shape index: {}]   ;;  %s3135_s3 = inlined_call_operand.hbm [shape: bf16[128,128], index: 3, kind: input, shape index: {}]   ;;  %s3136_s4 = inlined_call_operand.vmem [shape: f32[1,128], index: 4, kind: input, shape index: {}]   ;;  %s3137_s5 = inlined_call_operand.hbm [shape: bf16[128,128], index: 5, kind: input, shape index: {}]   ;;  %s3138_s6 = inlined_call_operand.vmem [shape: f32[1,128], index: 6, kind: input, shape index: {}]   ;;  %s3139_s7 = inlined_call_operand.hbm [shape: bf16[128,128], index: 7, kind: input, shape index: {}]   ;;  %s3140_s8 = inlined_call_operand.vmem [shape: f32[1,128], index: 8, kind: input, shape index: {}]   ;;  %s3141_s9 = inlined_call_operand.vmem [shape: f32[1,128], index: 9, kind: input, shape index: {}]   ;;  %s3142_s10 = inlined_call_operand.vmem [shape: f32[1,128], index: 10, kind: input, shape index: {}]   ;;  %s3143_s11 = inlined_call_operand.hbm [shape: bf16[128,128], index: 11, kind: input, shape index: {}]   ;;  %s3144_s12 = inlined_call_operand.vmem [shape: f32[1,128], index: 12, kind: input, shape index: {}]   ;;  %s3145_s13 = inlined_call_operand.hbm [shape: bf16[128,128], index: 13, kind: input, shape index: {}]   ;;  %s3146_s14 = inlined_call_operand.vmem [shape: f32[1,128], index: 14, kind: input, shape index: {}]   ;;  %s3147_s15 = inlined_call_operand.vmem [shape: f32[1,128], index: 15, kind: input, shape index: {}]   ;;  %s3148_s16 = inlined_call_operand.vmem [shape: f32[1,128], index: 16, kind: input, shape index: {}]   ;;  %s3149_s17 = inlined_call_operand.vmem [shape: f32[1,128], index: 17, kind: input, shape index: {}]   ;;  %s3150_s18 = inlined_call_operand.vmem [shape: f32[1,128], index: 18, kind: input, shape index: {}]   ;;  %s3151_s19 = inlined_call_operand.hbm [shape: bf16[2,8,128], index: 19, kind: output, shape index: {0}]   ;;  %s3152_s20 = inlined_call_operand.hbm [shape: bf16[2,8,8], index: 20, kind: output, shape index: {1}]  }
   0x1   :  { %3163 = sst [smem:[#allocation23_spill]] %s3132_s0 }
   0x2   :  { %3164 = sst [smem:[#allocation24_spill]] %s3133_s1 }
   0x3   :  { %3165 = sst [smem:[#allocation25_spill]] %s3134_s2 }
   0x4   :  { %3166 = sst [smem:[#allocation26_spill]] %s3135_s3 }
   0x5   :  { %3167 = sst [smem:[#allocation27_spill]] %s3136_s4 }
   0x6   :  { %3168 = sst [smem:[#allocation28_spill]] %s3137_s5 }
   0x7   :  { %3169 = sst [smem:[#allocation29_spill]] %s3138_s6 }
   0x8   :  { %3170 = sst [smem:[#allocation30_spill]] %s3139_s7 }
   0x9   :  { %3171 = sst [smem:[#allocation31_spill]] %s3140_s8 }
   0xa   :  { %3172 = sst [smem:[#allocation32_spill]] %s3144_s12 }
   0xb   :  { %3173 = sst [smem:[#allocation33_spill]] %s3146_s14 }
   0xc   :  { %3174 = sst [smem:[#allocation34_spill]] %s3147_s15 }
   0xd   :  { %3175 = sst [smem:[#allocation35_spill]] %s3148_s16 }
   0xe   :  { %3176 = sst [smem:[#allocation36_spill]] %s3151_s19 }
   0xf   :  { %3177 = sst [smem:[#allocation37_spill]] %s3152_s20 }
  0x10   :  { %26 = vsyncpa [#allocation3], 0 }
  0x11   :  { %28 = vsyncpa [#allocation3 + $0x1], 0 }
  0x12   :  { %29 = vsyncpa [#allocation6], 0 }
  0x13   :  { %30 = vsyncpa [#allocation9], 0 }
  0x14   :  { %31 = vsyncpa [#allocation12], 0 }
  0x15   :  { %32 = vsyncpa [#allocation4], 0 }
  0x16   :  { %34 = vsyncpa [#allocation4 + $0x1], 0 }
  0x17   :  { %35 = vsyncpa [#allocation16], 0 }
  0x18   :  { %37 = vsyncpa [#allocation16 + $0x1], 0  ;;  %s2651_s1 = smov 0   ;;  %s2653_s17 = smov 0  }
  0x19   :  { %s2655_s18 = smov 0   ;;  %s2657_s22 = smov 0  }
  0x1a LB: > { %s2533_s23 = smov [#allocation5]   ;;  %s2672_s2 = sadd.s32 4294967295, %s2531_s22   ;;  %s2531_s22 = sphi %s2657_s22, %s3216_s22   ;;  %s2527_s18 = sphi %s2655_s18, %s3215_s18   ;;  %s2523_s17 = sphi %s2653_s17, %s3214_s17   ;;  %s2519_s1 = sphi %s2651_s1, %s3213_s1  }
  0x1b   : > { %s516_s24 = sshll.u32 %s2533_s23, 4  ;;  %p1776_p0 = scmp.ge.s32.totalorder %s2531_s22, 1  ;;  %s2677_s24 = int_to_ptr.vmem [resolvable:$true] %s516_s24 }
  0x1c   : > { %p3159_p1 = scmp.eq.s32.totalorder %s2672_s2, 0  ;;  %p504_p2 = scmp.lt.s32.totalorder %s2531_s22, 3 }
  0x1d   : > { %s2534_s3 = smov [#allocation8]   ;;  %s2535_s28 = smov [#allocation11]  }
  0x1e   : > { %p2679_p3 = pnand %p1776_p0, %p504_p2  ;;  %s548_s26 = sshll.u32 %s2534_s3, 4  ;;  %s2692_s26 = int_to_ptr.vmem [resolvable:$true] %s548_s26 }
  0x1f   : > { %s586_s4 = sshll.u32 %s2535_s28, 4  ;;  %s3180_s0 = sld [smem:[#allocation24_spill]]  ;;  %s2694_s4 = int_to_ptr.vmem [resolvable:$true] %s586_s4 }
  0x20   : > { %s3178_s25 = scalar_select %p2679_p3, 1, 0 }
  0x21   : > { %p2081_p5 = pneg %p2679_p3 }
  0x23   : > { %p2688_p6 = pnand %p2081_p5, %p3159_p1 }
  0x25   : > { %s2223_s21 = scalar_lea.hbm %s3180_s0, 1024  ;;  %p2704_p8 = pneg %p2688_p6 }
  0x26   : > { %p2224_p7 = scmp.ne.s32.totalorder %s3180_s0, %s2223_s21  ;;  %p2230_p11 = scmp.lt.u32.totalorder %s2223_s21, %s3180_s0 }
  0x28   : > { %p2226_p9 = pnand %p2704_p8, %p2224_p7 }
  0x2a   : > { %p2227_p10 = pneg %p2226_p9 }
  0x2c   : > { %p2232_p12 = pnand %p2230_p11, %p2227_p10 }
  0x2e   : > { %2235 = shalt.err (!%p2232_p12)
}
  0x2f   : > { %s2236_s19 = scalar_lea.vmem %s2677_s24, 1024  ;;  %p2244_p5 = scmp.lt.s32.totalorder %s2677_s24, %s2677_s24 }
  0x30   : > { %p2237_p13 = scmp.ne.s32.totalorder %s2677_s24, %s2236_s19  ;;  %p2245_p4 = scmp.lt.s32.totalorder %s2236_s19, %s2236_s19 }
  0x32   : > { %p2239_p0 = pnand %p2237_p13, %p2704_p8  ;;  %p2246_p7 = por %p2245_p4, %p2244_p5 }
  0x34   : > { %p2240_p2 = pneg %p2239_p0 }
  0x36   : > { %p2247_p9 = pnand %p2246_p7, %p2240_p2 }
  0x38   : > { %2250 = shalt.err (!%p2247_p9)
}
  0x39   : > { %s2536_s29 = smov 64   ;;  %s2537_s16 = smov 4  }
  0x3a   : > { %2084 = dma.hbm_to_vmem [thread:$0]  (!%p2688_p6), %s3180_s0, 1024, %s2677_s24, [#allocation6], %s2536_s29, %s2536_s29, %s2537_s16  }
  0x3b   : > { %s3182_s5 = sld [smem:[#allocation28_spill]] }
  0x41   : > { %s2251_s19 = scalar_lea.hbm %s3182_s5, 1024 }
  0x42   : > { %p2252_p4 = scmp.ne.s32.totalorder %s3182_s5, %s2251_s19  ;;  %p2258_p12 = scmp.lt.u32.totalorder %s2251_s19, %s3182_s5 }
  0x44   : > { %p2254_p10 = pnand %p2252_p4, %p2704_p8 }
  0x46   : > { %p2255_p11 = pneg %p2254_p10 }
  0x48   : > { %p2260_p13 = pnand %p2258_p12, %p2255_p11 }
  0x4a   : > { %2263 = shalt.err (!%p2260_p13)
}
  0x4b   : > { %s2264_s24 = scalar_lea.vmem %s2692_s26, 1024  ;;  %p2272_p7 = scmp.lt.s32.totalorder %s2692_s26, %s2692_s26 }
  0x4c   : > { %p2265_p0 = scmp.ne.s32.totalorder %s2692_s26, %s2264_s24  ;;  %p2273_p9 = scmp.lt.s32.totalorder %s2264_s24, %s2264_s24 }
  0x4e   : > { %p2267_p2 = pnand %p2265_p0, %p2704_p8  ;;  %p2274_p4 = por %p2273_p9, %p2272_p7 }
  0x50   : > { %p2268_p5 = pneg %p2267_p2 }
  0x52   : > { %p2275_p10 = pnand %p2274_p4, %p2268_p5 }
  0x54   : > { %2278 = shalt.err (!%p2275_p10)
}
  0x55   : > { %2090 = dma.hbm_to_vmem [thread:$0]  (!%p2688_p6), %s3182_s5, 1024, %s2692_s26, [#allocation9], %s2536_s29, %s2536_s29, %s2537_s16  }
  0x56   : > { %s2279_s30 = scalar_lea.hbm %s3143_s11, 1024 }
  0x57   : > { %p2280_p11 = scmp.ne.s32.totalorder %s3143_s11, %s2279_s30  ;;  %p2286_p0 = scmp.lt.u32.totalorder %s2279_s30, %s3143_s11 }
  0x59   : > { %p2282_p12 = pnand %p2280_p11, %p2704_p8 }
  0x5b   : > { %p2283_p13 = pneg %p2282_p12 }
  0x5d   : > { %p2288_p2 = pnand %p2286_p0, %p2283_p13 }
  0x5f   : > { %2291 = shalt.err (!%p2288_p2)
}
  0x60   : > { %s2292_s26 = scalar_lea.vmem %s2694_s4, 1024  ;;  %p2300_p4 = scmp.lt.s32.totalorder %s2694_s4, %s2694_s4 }
  0x61   : > { %p2293_p5 = scmp.ne.s32.totalorder %s2694_s4, %s2292_s26  ;;  %p2301_p10 = scmp.lt.s32.totalorder %s2292_s26, %s2292_s26 }
  0x63   : > { %p2295_p7 = pnand %p2293_p5, %p2704_p8  ;;  %p2302_p11 = por %p2301_p10, %p2300_p4 }
  0x65   : > { %p2296_p9 = pneg %p2295_p7 }
  0x67   : > { %p2303_p12 = pnand %p2302_p11, %p2296_p9 }
  0x69   : > { %2306 = shalt.err (!%p2303_p12)
}
  0x6a   : > { %2096 = dma.hbm_to_vmem [thread:$0]  (!%p2688_p6), %s3143_s11, 1024, %s2694_s4, [#allocation12], %s2536_s29, %s2536_s29, %s2537_s16  }
  0x6b   : > { %s2538_s14 = smov [#allocation7]   ;;  %s2539_s20 = smov [#allocation10]  }
  0x6c   : > { %s532_s15 = sshll.u32 %s2538_s14, 4  ;;  %s564_s30 = sshll.u32 %s2539_s20, 4  ;;  %s533_s15 = int_to_ptr.vmem [resolvable:$true] %s532_s15  ;;  %s565_s30 = int_to_ptr.vmem [resolvable:$true] %s564_s30 }
  0x6d   : > { %s3183_s28 = sld [smem:[#allocation26_spill]] }
  0x73   : > { %s2307_s19 = scalar_lea.hbm %s3183_s28, 1024 }
  0x74   : > { %p2308_p13 = scmp.ne.s32.totalorder %s3183_s28, %s2307_s19  ;;  %p2314_p5 = scmp.lt.u32.totalorder %s2307_s19, %s3183_s28 }
  0x76   : > { %p2310_p0 = pnand %p2308_p13, %p2704_p8 }
  0x78   : > { %p2311_p2 = pneg %p2310_p0 }
  0x7a   : > { %p2316_p7 = pnand %p2314_p5, %p2311_p2 }
  0x7c   : > { %2319 = shalt.err (!%p2316_p7)
}
  0x7d   : > { %s2320_s4 = scalar_lea.vmem %s533_s15, 1024  ;;  %p2328_p11 = scmp.lt.s32.totalorder %s533_s15, %s533_s15 }
  0x7e   : > { %p2321_p9 = scmp.ne.s32.totalorder %s533_s15, %s2320_s4  ;;  %p2329_p12 = scmp.lt.s32.totalorder %s2320_s4, %s2320_s4 }
  0x80   : > { %p2323_p4 = pnand %p2321_p9, %p2704_p8  ;;  %p2330_p1 = por %p2329_p12, %p2328_p11 }
  0x82   : > { %p2324_p10 = pneg %p2323_p4 }
  0x84   : > { %p2331_p3 = pnand %p2330_p1, %p2324_p10 }
  0x86   : > { %2334 = shalt.err (!%p2331_p3)
}
  0x87   : > { %2087 = dma.hbm_to_vmem [thread:$0]  (!%p2688_p6), %s3183_s28, 1024, %s533_s15, [#allocation6], %s2536_s29, %s2536_s29, %s2537_s16  }
  0x88   : > { %s3184_s7 = sld [smem:[#allocation30_spill]] }
  0x8e   : > { %s2335_s20 = scalar_lea.hbm %s3184_s7, 1024 }
  0x8f   : > { %p2336_p1 = scmp.ne.s32.totalorder %s3184_s7, %s2335_s20  ;;  %p2342_p0 = scmp.lt.u32.totalorder %s2335_s20, %s3184_s7 }
  0x91   : > { %p2338_p3 = pnand %p2336_p1, %p2704_p8 }
  0x93   : > { %p2339_p13 = pneg %p2338_p3 }
  0x95   : > { %p2344_p2 = pnand %p2342_p0, %p2339_p13 }
  0x97   : > { %2347 = shalt.err (!%p2344_p2)
}
  0x98   : > { %s2348_s24 = scalar_lea.vmem %s565_s30, 1024  ;;  %p2356_p4 = scmp.lt.s32.totalorder %s565_s30, %s565_s30 }
  0x99   : > { %p2349_p5 = scmp.ne.s32.totalorder %s565_s30, %s2348_s24  ;;  %p2357_p10 = scmp.lt.s32.totalorder %s2348_s24, %s2348_s24 }
  0x9b   : > { %p2351_p7 = pnand %p2349_p5, %p2704_p8  ;;  %p2358_p11 = por %p2357_p10, %p2356_p4 }
  0x9d   : > { %p2352_p9 = pneg %p2351_p7 }
  0x9f   : > { %p2359_p12 = pnand %p2358_p11, %p2352_p9 }
  0xa1   : > { %2362 = shalt.err (!%p2359_p12)
}
  0xa2   : > { %2093 = dma.hbm_to_vmem [thread:$0]  (!%p2688_p6), %s3184_s7, 1024, %s565_s30, [#allocation9], %s2536_s29, %s2536_s29, %s2537_s16  }
  0xa3   : > { %s2540_s5 = smov [#allocation13]   ;;  %s2363_s20 = scalar_lea.hbm %s3145_s13, 1024 }
  0xa4   : > { %s602_s0 = sshll.u32 %s2540_s5, 4  ;;  %p2364_p1 = scmp.ne.s32.totalorder %s3145_s13, %s2363_s20  ;;  %s603_s0 = int_to_ptr.vmem [resolvable:$true] %s602_s0 }
  0xa5   : > { %p2370_p0 = scmp.lt.u32.totalorder %s2363_s20, %s3145_s13 }
  0xa6   : > { %p2366_p3 = pnand %p2364_p1, %p2704_p8 }
  0xa8   : > { %p2367_p13 = pneg %p2366_p3 }
  0xaa   : > { %p2372_p2 = pnand %p2370_p0, %p2367_p13 }
  0xac   : > { %2375 = shalt.err (!%p2372_p2)
}
  0xad   : > { %s2376_s30 = scalar_lea.vmem %s603_s0, 1024  ;;  %p2384_p4 = scmp.lt.s32.totalorder %s603_s0, %s603_s0 }
  0xae   : > { %p2377_p5 = scmp.ne.s32.totalorder %s603_s0, %s2376_s30  ;;  %p2385_p10 = scmp.lt.s32.totalorder %s2376_s30, %s2376_s30 }
  0xb0   : > { %p2379_p7 = pnand %p2377_p5, %p2704_p8  ;;  %p2386_p11 = por %p2385_p10, %p2384_p4 }
  0xb2   : > { %p2380_p9 = pneg %p2379_p7 }
  0xb4   : > { %p2387_p12 = pnand %p2386_p11, %p2380_p9 }
  0xb6   : > { %2390 = shalt.err (!%p2387_p12)
}
  0xb7   : > { %2099 = dma.hbm_to_vmem [thread:$0]  (!%p2688_p6), %s3145_s13, 1024, %s603_s0, [#allocation12], %s2536_s29, %s2536_s29, %s2537_s16  }
  0xb8   : > { %s1775_s27 = sadd.s32 4294967294, %s2531_s22   ;;  %s2845_s3 = sadd.s32 1, %s2531_s22  }
  0xb9   : > { %s47_s4 = ssub.s32 %s2531_s22, %s2845_s3  ;;  %s50_s5 = sadd.s32 1, %s2527_s18 }
  0xba   : > { %p48_p8 = scmp.eq.s32.totalorder %s47_s4, 0  ;;  %p57_p1 = scmp.ne.s32.totalorder %s2527_s18, %s2523_s17 }
  0xbb   : > { %p58_p3 = scmp.eq.s32.totalorder %s2531_s22, 0  ;;  %p63_p13 = scmp.ne.s32.totalorder %s2523_s17, %s2519_s1 }
  0xbc   : > { %s2856_s12 = scalar_select %p48_p8, %s2527_s18, %s50_s5  }
  0xbd   : > { %p2858_p0 = por %p58_p3, %p57_p1  ;;  %p3186_p2 = scmp.eq.s32.totalorder %s2672_s2, 0 }
  0xbe   : > { %p465_p5 = scmp.eq.s32.totalorder %s2672_s2, 1  ;;  %p471_p7 = scmp.eq.s32.totalorder %s1775_s27, 1 }
  0xbf   : > { %p2864_p6 = por %p3186_p2, %p63_p13  ;;  %p2117_p9 = scmp.lt.s32.totalorder %s2531_s22, 2 }
  0xc0   : > { %s631_s16 = sand.u32 1, %s2527_s18   ;;  %p2871_p4 = por %p465_p5, %p57_p1 }
  0xc1   : > { %p2875_p10 = por %p471_p7, %p63_p13  ;;  %s1784_s21 = sshll.u32 %s631_s16, 3 }
  0xc2   : > { %s3188_s0 = scalar_select %p2871_p4, 1, 0 }
  0xc3   : > { %s3189_s20 = scalar_select %p2875_p10, 1, 0 }
  0xc4   : > { %s1785_s23 = sshll.u32 %s2531_s22, 7  ;;  %s3190_s30 = sld [smem:[#allocation23_spill]] }
  0xc5   : > { %s635_s15 = scalar_lea.vmem [#allocation2], %s1784_s21  ;;  %p2889_p11 = pnand %p2117_p9, %p2858_p0 }
  0xc6   : > { %s642_s27 = sshll.u32 %s635_s15, 4  ;;  %s632_s5 = scalar_lea.sflag [#allocation3], %s631_s16  ;;  %s2885_s27 = int_to_ptr.vmem [resolvable:$true] %s642_s27 }
  0xc7   : > { %p2393_p8 = pneg %p2889_p11 }
  0xca   : > { %s2883_s24 = scalar_lea.hbm %s3190_s30, %s1785_s23  ;;  %s2396_s19 = scalar_lea.hbm %s3190_s30, 256 }
  0xcb   : > { %s2391_s7 = scalar_lea.hbm %s2883_s24, 128  ;;  %p2397_p13 = scmp.lt.u32.totalorder %s2883_s24, %s3190_s30 }
  0xcc   : > { %p2392_p12 = scmp.ne.s32.totalorder %s2883_s24, %s2391_s7  ;;  %p2398_p0 = scmp.lt.u32.totalorder %s2396_s19, %s2391_s7 }
  0xcd   : > { %p2400_p5 = scmp.lt.u32.totalorder %s2391_s7, %s2883_s24 }
  0xce   : > { %p2394_p1 = pnand %p2393_p8, %p2392_p12  ;;  %p2399_p2 = por %p2398_p0, %p2397_p13 }
  0xd0   : > { %p2395_p3 = pneg %p2394_p1  ;;  %p2401_p7 = por %p2400_p5, %p2399_p2 }
  0xd2   : > { %p2402_p9 = pnand %p2401_p7, %p2395_p3 }
  0xd4   : > { %2405 = shalt.err (!%p2402_p9)
}
  0xd5   : > { %s2406_s16 = scalar_lea.vmem %s2885_s27, 128  ;;  %s2541_s15 = smov [#allocation2]  }
  0xd6   : > { %p2407_p12 = scmp.ne.s32.totalorder %s2885_s27, %s2406_s16  ;;  %s2411_s21 = sshll.u32 %s2541_s15, 4  ;;  %s2412_s21 = int_to_ptr.vmem [resolvable:$false] %s2411_s21 }
  0xd7   : > { %s2413_s23 = scalar_lea.vmem %s2412_s21, 256  ;;  %p2414_p4 = scmp.lt.s32.totalorder %s2885_s27, %s2412_s21 }
  0xd8   : > { %p2409_p1 = pnand %p2407_p12, %p2393_p8  ;;  %p2415_p13 = scmp.lt.s32.totalorder %s2413_s23, %s2406_s16 }
  0xda   : > { %p2410_p10 = pneg %p2409_p1  ;;  %p2416_p0 = por %p2415_p13, %p2414_p4 }
  0xdc   : > { %p2417_p2 = pnand %p2416_p0, %p2410_p10 }
  0xde   : > { %2420 = shalt.err (!%p2417_p2)
}
  0xdf   : > { %2103 = dma.hbm_to_vmem [thread:$0]  (!%p2889_p11), %s2883_s24, 128, %s2885_s27, %s632_s5  }
  0xe0   : > { %p3192_p3 = scmp.ne.s32.totalorder %s3178_s25, 0 }
  0xe1   : > { %s2921_s7 = sand.u32 (!%p3192_p3), 1, %s2523_s17  }
  0xe2   : > { %651 = sbr.rel (%p3192_p3) target bundleno = 2246 (0x8c6), region = 96  ;;  %s1787_s19 = sshll.u32 (!%p3192_p3), %s2921_s7, 3 }
  0xe3   : > { %s654_s14 = scalar_lea.sflag (!%p3192_p3), [#allocation3], %s2921_s7  ;;  %s2925_s26 = scalar_lea.vmem (!%p3192_p3), [#allocation2], %s1787_s19 }
  0xe9   : > { %2494 = dma.done.wait (%p2864_p6), %s654_s14, 128  }
  0xea   : > { %2496 = vsyncadd (%p2864_p6), %s654_s14, 4294967168  ;;  %p3193_p4 = scmp.eq.s32.totalorder %s2672_s2, 0 }
  0xec   : > { %2498 = dma.done.wait (%p3193_p4), [#allocation6], 2048   ;;  %p3194_p10 = pmov %p3193_p4 }
  0xed   : > { %p3195_p11 = pmov %p3193_p4 }
  0xee   : > { %2500 = vsyncadd (%p3194_p10), [#allocation6], 4294965248 }
  0xef   : > { %2502 = dma.done.wait (%p3195_p11), [#allocation9], 2048   ;;  %p3196_p8 = pmov %p3193_p4 }
  0xf0   : > { %p3197_p5 = pmov %p3193_p4 }
  0xf1   : > { %2504 = vsyncadd (%p3196_p8), [#allocation9], 4294965248 }
  0xf2   : > { %2506 = dma.done.wait (%p3197_p5), [#allocation12], 2048   ;;  %p3198_p7 = pmov %p3193_p4 }
  0xf3   : > { %v2542_v0 = vmov 0.0   ;;  %vm2543_vm0 = vmmov 0   ;;  %v2167_v1 = vld [vmem:[#allocation7] sm:$0xff]   ;;  %v2169_v3 = vld [vmem:[#allocation7 + $0x8] sm:$0xff]   ;;  %v2171_v5 = vld [vmem:[#allocation7 + $0x10] sm:$0xff]   ;;  %s3199_s24 = sld [smem:[#allocation27_spill]] }
  0xf4   : > { %2508 = vsyncadd (%p3198_p7), [#allocation12], 4294965248  ;;  %1939 = vmatprep.subr.bf16.mxu1 %v2542_v0  ;;  %1919 = vmatprep.subr.bf16.mxu0 %v2542_v0  ;;  %v2168_v2 = vld [vmem:[#allocation5] sm:$0xff]   ;;  %v2170_v4 = vld [vmem:[#allocation5 + $0x8] sm:$0xff]   ;;  %s3200_s5 = sld [smem:[#allocation25_spill]]  ;;  %s3201_s6 = sld [smem:[#allocation29_spill]] }
  0xf5   : > { %1955 = vmatprep.mubr.msk.bf16.mxu1 %vm2543_vm0, %v2542_v0  ;;  %1935 = vmatprep.mubr.msk.bf16.mxu0 %vm2543_vm0, %v2542_v0  ;;  %v2172_v6 = vld [vmem:[#allocation5 + $0x10] sm:$0xff]   ;;  %v2173_v7 = vld [vmem:[#allocation7 + $0x18] sm:$0xff]   ;;  %v2175_v9 = vld [vmem:[#allocation7 + $0x20] sm:$0xff]   ;;  %vm1141_vm1 = vcmask 1043456   ;;  %vm1123_vm2 = vcmask 64512   ;;  %s1794_s21 = sshll.u32 %s2921_s7, 2 }
  0xf6   : > { %1940 = vmatpush3.bf16.msra.mxu1 %v2167_v1  ;;  %1920 = vmatpush3.bf16.msra.mxu0 %v2168_v2  ;;  %v2174_v8 = vld [vmem:[#allocation5 + $0x18] sm:$0xff]   ;;  %v2176_v10 = vld [vmem:[#allocation5 + $0x20] sm:$0xff]   ;;  %v2177_v11 = vld [vmem:[#allocation7 + $0x28] sm:$0xff]   ;;  %vm1136_vm3 = vcmask 60416   ;;  %s3003_s23 = scalar_lea.vmem [#allocation15], %s1794_s21  ;;  %s3202_s8 = sld [smem:[#allocation31_spill]] }
  0xf7   : > { %1941 = vmatprep.subr.bf16.mxu1 %v2542_v0  ;;  %1921 = vmatprep.subr.bf16.mxu0 %v2542_v0  ;;  %v2178_v12 = vld [vmem:[#allocation5 + $0x28] sm:$0xff]   ;;  %v2179_v13 = vld [vmem:[#allocation7 + $0x30] sm:$0xff]   ;;  %v2181_v15 = vld [vmem:[#allocation7 + $0x38] sm:$0xff]   ;;  %s3204_s19 = sld [smem:[#allocation33_spill]]  ;;  %s3162_s14 = sshll.u32 %s2672_s2, 6 }
  0xf8   : > { %v2180_v14 = vld [vmem:[#allocation5 + $0x30] sm:$0xff]   ;;  %v2182_v17 = vld [vmem:[#allocation5 + $0x38] sm:$0xff]   ;;  %v2183_v19 = vld [vmem:[#allocation8] sm:$0xff]   ;;  %s3205_s29 = sld [smem:[#allocation37_spill]]  ;;  %s1616_s27 = sshll.u32 %s3003_s23, 4  ;;  %s1617_s27 = int_to_ptr.vmem [resolvable:$true] %s1616_s27 }
  0xf9   : > { %v2962_v16 = vld [vmem:[%s2925_s26] sm:$0xff]  ;;  %v2184_v20 = vld [vmem:[#allocation8 + $0x8] sm:$0xff]   ;;  %v2187_v23 = vld [vmem:[#allocation8 + $0x20] sm:$0xff]   ;;  %s1590_s4 = scalar_lea.sflag [#allocation16], %s2921_s7  ;;  %p3206_p9 = scmp.ne.s32.totalorder %s3188_s0, 0 }
  0xfa   : > { %1942 = vmatpush3.bf16.msra.mxu1 %v2169_v3  ;;  %1922 = vmatpush3.bf16.msra.mxu0 %v2170_v4  ;;  %v745_v18 = vpack.c.bf16 %v2962_v16, %v2962_v16  ;;  %v2185_v21 = vld [vmem:[#allocation8 + $0x10] sm:$0xff]   ;;  %v2186_v22 = vld [vmem:[#allocation8 + $0x18] sm:$0xff]   ;;  %v2188_v24 = vld [vmem:[#allocation8 + $0x28] sm:$0xff]   ;;  %s2544_s16 = smov [#allocation15]  }
  0xfb   : > { %1943 = vmatprep.subr.bf16.mxu1 %v2542_v0  ;;  %1923 = vmatprep.subr.bf16.mxu0 %v2542_v0  ;;  %v2189_v25 = vld [vmem:[#allocation8 + $0x30] sm:$0xff]   ;;  %v2190_v26 = vld [vmem:[#allocation8 + $0x38] sm:$0xff]   ;;  %v2191_v63 = vld [vmem:[#allocation10] sm:$0xff]   ;;  %s2425_s15 = sshll.u32 %s2544_s16, 4  ;;  %s2426_s15 = int_to_ptr.vmem [resolvable:$false] %s2425_s15 }
  0xfc   : > { %v1805_v27 = vld [vmem:[%s3199_s24] ss:$0 sm:$0xff]  ;;  %v2192_v2 = vld [vmem:[#allocation10 + $0x8] sm:$0xff]   ;;  %v2194_v4 = vld [vmem:[#allocation10 + $0x18] sm:$0xff]   ;;  %p2428_p13 = scmp.lt.s32.totalorder %s1617_s27, %s2426_s15 }
  0xfd   : > { %v1796_v28 = vld [vmem:[%s3200_s5] ss:$0 sm:$0xff]  ;;  %s3203_s5 = sld [smem:[#allocation32_spill]] }
  0xfe   : > { %1944 = vmatpush3.bf16.msra.mxu1 %v2171_v5  ;;  %1924 = vmatpush3.bf16.msra.mxu0 %v2172_v6  ;;  %v1814_v42 = vld [vmem:[%s3201_s6] ss:$0 sm:$0xff]  ;;  %v2195_v5 = vld [vmem:[#allocation10 + $0x20] sm:$0xff]   ;;  %v2196_v6 = vld [vmem:[#allocation10 + $0x28] sm:$0xff]   ;;  %s3054_s24 = scalar_lea.hbm %s3205_s29, %s3162_s14 }
  0xff   : > { %1945 = vmatprep.subr.bf16.mxu1 %v2542_v0  ;;  %1925 = vmatprep.subr.bf16.mxu0 %v2542_v0  ;;  %v2193_v3 = vld [vmem:[#allocation10 + $0x10] sm:$0xff]  }
 0x102   : > { %1946 = vmatpush3.bf16.msra.mxu1 %v2173_v7  ;;  %1926 = vmatpush3.bf16.msra.mxu0 %v2174_v8  ;;  %v2197_v7 = vld [vmem:[#allocation10 + $0x30] sm:$0xff]   ;;  %v2198_v8 = vld [vmem:[#allocation10 + $0x38] sm:$0xff]  }
 0x103   : > { %1947 = vmatprep.subr.bf16.mxu1 %v2542_v0  ;;  %1927 = vmatprep.subr.bf16.mxu0 %v2542_v0 }
 0x106   : > { %1948 = vmatpush3.bf16.msra.mxu1 %v2175_v9  ;;  %1928 = vmatpush3.bf16.msra.mxu0 %v2176_v10 }
 0x107   : > { %1949 = vmatprep.subr.bf16.mxu1 %v2542_v0  ;;  %1929 = vmatprep.subr.bf16.mxu0 %v2542_v0 }
 0x10a   : > { %1950 = vmatpush3.bf16.msra.mxu1 %v2177_v11  ;;  %1930 = vmatpush3.bf16.msra.mxu0 %v2178_v12 }
 0x10b   : > { %1951 = vmatprep.subr.bf16.mxu1 %v2542_v0  ;;  %1931 = vmatprep.subr.bf16.mxu0 %v2542_v0 }
 0x10e   : > { %1952 = vmatpush3.bf16.msra.mxu1 %v2179_v13  ;;  %1932 = vmatpush3.bf16.msra.mxu0 %v2180_v14  ;;  %v2199_v14 = vld [vmem:[#allocation11] sm:$0xff]  }
 0x10f   : > { %1953 = vmatprep.subr.bf16.mxu1 %v2542_v0  ;;  %1933 = vmatprep.subr.bf16.mxu0 %v2542_v0 }
 0x112   : > { %1954 = vmatpush3.bf16.msra.mxu1 %v2181_v15  ;;  %1934 = vmatpush3.bf16.msra.mxu0 %v2182_v17  ;;  %v1824_v15 = vld [vmem:[%s3202_s8] ss:$0 sm:$0xff] }
 0x113   : > { %1985 = vmatprep.subr.bf16.mxu1 %v2542_v0  ;;  %1959 = vmatprep.subr.bf16.mxu0 %v2542_v0 }
 0x115   : > { %1956 = vmatmul.mubr.bf16.vlgmr.msra.gmra.mrb[0].mxu1 %v745_v18  ;;  %1936 = vmatmul.mubr.bf16.vlgmr.msra.gmra.mrb[0].mxu0 %v745_v18 }
 0x116   : > { %1987 = vmatprep.mubr.msk.bf16.mxu1 %vm2543_vm0, %v2542_v0  ;;  %1960 = vmatpush3.bf16.msra.mxu0 %v2183_v19 }
 0x117   : > { %1975 = vmatprep.mubr.msk.bf16.mxu0 %vm2543_vm0, %v2542_v0  ;;  %1961 = vmatprep.subr.bf16.mxu0 %v2542_v0 }
 0x11a   : > { %1962 = vmatpush3.bf16.msra.mxu0 %v2184_v20 }
 0x11b   : > { %1963 = vmatprep.subr.bf16.mxu0 %v2542_v0 }
 0x11e   : > { %1964 = vmatpush3.bf16.msra.mxu0 %v2185_v21 }
 0x11f   : > { %1965 = vmatprep.subr.bf16.mxu0 %v2542_v0 }
 0x122   : > { %1966 = vmatpush3.bf16.msra.mxu0 %v2186_v22 }
 0x123   : > { %1967 = vmatprep.subr.bf16.mxu0 %v2542_v0 }
 0x126   : > { %1968 = vmatpush3.bf16.msra.mxu0 %v2187_v23 }
 0x127   : > { %1969 = vmatprep.subr.bf16.mxu0 %v2542_v0 }
 0x12a   : > { %1970 = vmatpush3.bf16.msra.mxu0 %v2188_v24  ;;  %v2200_v24 = vld [vmem:[#allocation11 + $0x8] sm:$0xff]  }
 0x12b   : > { %1971 = vmatprep.subr.bf16.mxu0 %v2542_v0 }
 0x12e   : > { %1972 = vmatpush3.bf16.msra.mxu0 %v2189_v25  ;;  %v2201_v25 = vld [vmem:[#allocation11 + $0x10] sm:$0xff]  }
 0x12f   : > { %1973 = vmatprep.subr.bf16.mxu0 %v2542_v0 }
 0x132   : > { %1974 = vmatpush3.bf16.msra.mxu0 %v2190_v26  ;;  %v2202_v26 = vld [vmem:[#allocation11 + $0x18] sm:$0xff]  }
 0x133   : > { %1979 = vmatprep.subr.bf16.mxu0 %v2542_v0 }
 0x135   : > { %1976 = vmatmul.mubr.bf16.vlgmr.msra.gmra.mrb[4].mxu0 %v745_v18 }
 0x136   : > { %1981 = vmatprep.mubr.msk.bf16.mxu0 %vm2543_vm0, %v2542_v0 }
 0x1e8   : > { %v962_v29 = vpop.f32.mrb[0].mxu1  ;;  %v851_v32 = vpop.f32.mrb[0].mxu0 }
 0x1e9   : > { %v963_v30 = vadd.f32 %v1805_v27, %v962_v29  ;;  %v1957_v31 = vpop.f32.mrb[1].mxu1  ;;  %v852_v34 = vadd.f32 %v1796_v28, %v851_v32  ;;  %v1937_v35 = vpop.f32.mrb[1].mxu0  ;;  %v2203_v27 = vld [vmem:[#allocation11 + $0x20] sm:$0xff]   ;;  %v2204_v28 = vld [vmem:[#allocation11 + $0x28] sm:$0xff]   ;;  %v2206_v29 = vld [vmem:[#allocation11 + $0x38] sm:$0xff]  }
 0x1ea   : > { %v965_v33 = vpop.f32.mrb[2].mxu1  ;;  %v854_v38 = vpop.f32.mrb[2].mxu0  ;;  %v2208_v31 = vld [vmem:[#allocation13 + $0x8] sm:$0xff]   ;;  %v2209_v32 = vld [vmem:[#allocation13 + $0x10] sm:$0xff]  }
 0x1eb   : > { %v1081_v36 = vpack.c.bf16 %v963_v30, %v963_v30  ;;  %v1958_v37 = vpop.f32.mrb[3].mxu1  ;;  %v1079_v39 = vmul.f32 0.17677669, %v852_v34  ;;  %v1938_v40 = vpop.f32.mrb[3].mxu0  ;;  %v2207_v30 = vld [vmem:[#allocation13] sm:$0xff]   ;;  %v2210_v33 = vld [vmem:[#allocation13 + $0x18] sm:$0xff]  }
 0x1ec   : > { %v2211_v34 = vld [vmem:[#allocation13 + $0x20] sm:$0xff]   ;;  %v2212_v35 = vld [vmem:[#allocation13 + $0x28] sm:$0xff]  }
 0x1ed   : > { %1980 = vmatpush3.bf16.xpose.msra.mxu0 %v1081_v36  ;;  %v1080_v41 = vpack.c.bf16 %v1079_v39, %v1079_v39 }
 0x1ee   : > { %2011 = vmatprep.subr.bf16.mxu0 %v2542_v0 }
 0x1f4   : > { %1982 = vmatmul.mubr.bf16.vlgmr.msra.gmra.mrb[8].mxu0 %v1080_v41 }
 0x1f5   : > { %2027 = vmatprep.mubr.msk.bf16.mxu0 %vm2543_vm0, %v2542_v0  ;;  %2012 = vmatpush3.bf16.msra.mxu0 %v2199_v14 }
 0x1f6   : > { %2013 = vmatprep.subr.bf16.mxu0 %v2542_v0 }
 0x1f9   : > { %2014 = vmatpush3.bf16.msra.mxu0 %v2200_v24 }
 0x1fa   : > { %2015 = vmatprep.subr.bf16.mxu0 %v2542_v0 }
 0x1fd   : > { %2016 = vmatpush3.bf16.msra.mxu0 %v2201_v25 }
 0x1fe   : > { %2017 = vmatprep.subr.bf16.mxu0 %v2542_v0 }
 0x201   : > { %2018 = vmatpush3.bf16.msra.mxu0 %v2202_v26 }
 0x202   : > { %2019 = vmatprep.subr.bf16.mxu0 %v2542_v0 }
 0x205   : > { %2020 = vmatpush3.bf16.msra.mxu0 %v2203_v27 }
 0x206   : > { %2021 = vmatprep.subr.bf16.mxu0 %v2542_v0 }
 0x208   : > { %v1073_v43 = vpop.f32.mrb[4].mxu0 }
 0x209   : > { %v1074_v44 = vadd.f32 %v1814_v42, %v1073_v43  ;;  %v1977_v45 = vpop.f32.mrb[5].mxu0  ;;  %2022 = vmatpush3.bf16.msra.mxu0 %v2204_v28 }
 0x20a   : > { %v1076_v46 = vpop.f32.mrb[6].mxu0  ;;  %2023 = vmatprep.subr.bf16.mxu0 %v2542_v0  ;;  %v1833_v45 = vld [vmem:[%s3141_s9] ss:$0 sm:$0xff] }
 0x20b   : > { %v1082_v47 = vpack.c.bf16 %v1074_v44, %v1074_v44  ;;  %v1978_v48 = vpop.f32.mrb[7].mxu0 }
 0x20d   : > { %v1143_v49 = vsel %vm1141_vm1, %v1082_v47, 0  ;;  %v1834_v47 = vld [vmem:[%s3142_s10] ss:$0 sm:$0xff] }
 0x20e   : > { %1986 = vmatpush3.bf16.msra.mxu1 %v1143_v49 }
 0x20f   : > { %1991 = vmatprep.subr.bf16.mxu1 %v2542_v0 }
 0x2c7   : > { %v1117_v50 = vpop.f32.mrb[8].mxu0 }
 0x2c8   : > { %v1983_v51 = vpop.f32.mrb[9].mxu0  ;;  %v1124_v52 = vsel %vm1123_vm2, %v1117_v50, -inf }
 0x2c9   : > { %1125 = vmax.xlane.f32.xlu0 %v1124_v52  ;;  %v1120_v53 = vpop.f32.mrb[10].mxu0  ;;  %v2213_v51 = vld [vmem:[#allocation13 + $0x30] sm:$0xff]   ;;  %v2214_v52 = vld [vmem:[#allocation13 + $0x38] sm:$0xff]  }
 0x2ca   : > { %v1984_v54 = vpop.f32.mrb[11].mxu0  ;;  %v1835_v53 = vld [vmem:[%s3203_s5] ss:$0 sm:$0xff]  ;;  %s2421_s5 = scalar_lea.vmem %s1617_s27, 64 }
 0x2cb   : > { %p2422_p6 = scmp.ne.s32.totalorder %s1617_s27, %s2421_s5 }
 0x2cd   : > { %p2423_p12 = pnand %p2422_p6, %p3206_p9 }
 0x2cf   : > { %p2424_p1 = pneg %p2423_p12 }
 0x356   : > { %v1126_v55 = vpop.xlane.xlu0 %1125 }
 0x357   : > { %v1127_v56 = vsub.f32 %v1117_v50, %v1126_v55 }
 0x359   : > { %v1128_v57 = vmul.f32 1.442695, %v1127_v56 }
 0x35b   : > { %2215 = vpow2.f32 %v1128_v57 }
 0x365   : > { %v2216_v58 = vpop.eup %2215 }
 0x366   : > { %v1130_v59 = vsel %vm1123_vm2, %v2216_v58, 0.0 }
 0x367   : > { %1131 = vadd.xlane.f32.xlu0 %v1130_v59 }
 0x3f4   : > { %v1132_v60 = vpop.xlane.xlu0 %1131 }
 0x3f5   : > { %2217 = vrcp.f32 %v1132_v60 }
 0x3ff   : > { %v2218_v61 = vpop.eup %2217 }
 0x400   : > { %v1134_v62 = vmul.f32 %v2218_v61, %v2216_v58 }
 0x402   : > { %v1135_v1 = vpack.c.bf16 %v1134_v62, %v1134_v62 }
 0x404   : > { %1988 = vmatmul.mubr.msk.bf16.vlgmr.msra.gmra.mrb[4].mxu1 %vm1123_vm2, %v1135_v1  ;;  %1137 = vst.msk [vmem:[%s3003_s23] sm:$0xf] %vm1136_vm3, %v1135_v1 }
 0x405   : > { %1992 = vmatpush3.bf16.msra.mxu1 %v2191_v63  ;;  %2007 = vmatprep.mubr.msk.bf16.mxu1 %vm2543_vm0, %v2542_v0 }
 0x406   : > { %1993 = vmatprep.subr.bf16.mxu1 %v2542_v0 }
 0x409   : > { %1994 = vmatpush3.bf16.msra.mxu1 %v2192_v2 }
 0x40a   : > { %1995 = vmatprep.subr.bf16.mxu1 %v2542_v0 }
 0x40d   : > { %1996 = vmatpush3.bf16.msra.mxu1 %v2193_v3 }
 0x40e   : > { %1997 = vmatprep.subr.bf16.mxu1 %v2542_v0 }
 0x411   : > { %1998 = vmatpush3.bf16.msra.mxu1 %v2194_v4 }
 0x412   : > { %1999 = vmatprep.subr.bf16.mxu1 %v2542_v0 }
 0x415   : > { %2000 = vmatpush3.bf16.msra.mxu1 %v2195_v5 }
 0x416   : > { %2001 = vmatprep.subr.bf16.mxu1 %v2542_v0 }
 0x419   : > { %2002 = vmatpush3.bf16.msra.mxu1 %v2196_v6 }
 0x41a   : > { %2003 = vmatprep.subr.bf16.mxu1 %v2542_v0 }
 0x41d   : > { %2004 = vmatpush3.bf16.msra.mxu1 %v2197_v7 }
 0x41e   : > { %2005 = vmatprep.subr.bf16.mxu1 %v2542_v0 }
 0x421   : > { %2006 = vmatpush3.bf16.msra.mxu1 %v2198_v8 }
 0x422   : > { %2031 = vmatprep.subr.bf16.mxu1 %v2542_v0 }
 0x4d7   : > { %v1179_v9 = vpop.f32.mrb[4].mxu1 }
 0x4d8   : > { %v1185_v10 = vpack.c.bf16 %v1179_v9, %v1179_v9  ;;  %v1989_v11 = vpop.f32.mrb[5].mxu1 }
 0x4d9   : > { %v1182_v12 = vpop.f32.mrb[6].mxu1 }
 0x4da   : > { %v1990_v13 = vpop.f32.mrb[7].mxu1  ;;  %2008 = vmatmul.mubr.bf16.vlgmr.msra.gmra.mrb[8].mxu1 %v1185_v10 }
 0x4db   : > { %2047 = vmatprep.mubr.msk.bf16.mxu1 %vm2543_vm0, %v2542_v0  ;;  %2032 = vmatpush3.bf16.msra.mxu1 %v2207_v30 }
 0x4dc   : > { %2033 = vmatprep.subr.bf16.mxu1 %v2542_v0 }
 0x4df   : > { %2034 = vmatpush3.bf16.msra.mxu1 %v2208_v31 }
 0x4e0   : > { %2035 = vmatprep.subr.bf16.mxu1 %v2542_v0 }
 0x4e3   : > { %2036 = vmatpush3.bf16.msra.mxu1 %v2209_v32 }
 0x4e4   : > { %2037 = vmatprep.subr.bf16.mxu1 %v2542_v0 }
 0x4e7   : > { %2038 = vmatpush3.bf16.msra.mxu1 %v2210_v33 }
 0x4e8   : > { %2039 = vmatprep.subr.bf16.mxu1 %v2542_v0 }
 0x4eb   : > { %2040 = vmatpush3.bf16.msra.mxu1 %v2211_v34 }
 0x4ec   : > { %2041 = vmatprep.subr.bf16.mxu1 %v2542_v0 }
 0x4ef   : > { %2042 = vmatpush3.bf16.msra.mxu1 %v2212_v35 }
 0x4f0   : > { %2043 = vmatprep.subr.bf16.mxu1 %v2542_v0 }
 0x4f3   : > { %2044 = vmatpush3.bf16.msra.mxu1 %v2213_v51 }
 0x4f4   : > { %2045 = vmatprep.subr.bf16.mxu1 %v2542_v0 }
 0x4f7   : > { %2046 = vmatpush3.bf16.msra.mxu1 %v2214_v52 }
 0x5ad   : > { %v1291_v17 = vpop.f32.mrb[8].mxu1 }
 0x5ae   : > { %v1292_v18 = vadd.f32 %v1824_v15, %v1291_v17  ;;  %v2009_v19 = vpop.f32.mrb[9].mxu1 }
 0x5af   : > { %v1294_v20 = vpop.f32.mrb[10].mxu1 }
 0x5b0   : > { %v1297_v21 = vadd.f32 %v1292_v18, %v2962_v16  ;;  %v2010_v22 = vpop.f32.mrb[11].mxu1  ;;  %v2205_v16 = vld [vmem:[#allocation11 + $0x30] sm:$0xff]  }
 0x5b1   : > { %2024 = vmatpush3.bf16.msra.mxu0 %v2205_v16 }
 0x5b2   : > { %1300 = vadd.xlane.f32.xlu1 %v1297_v21  ;;  %v1302_v23 = vmul.f32 %v1297_v21, %v1297_v21  ;;  %2025 = vmatprep.subr.bf16.mxu0 %v2542_v0  ;;  %v1844_v0 = vld [vmem:[%s3204_s19] ss:$0 sm:$0xff]  ;;  %s2427_s19 = scalar_lea.vmem %s2426_s15, 128 }
 0x5b3   : > { %p2429_p0 = scmp.lt.s32.totalorder %s2427_s19, %s2421_s5 }
 0x5b5   : > { %2026 = vmatpush3.bf16.msra.mxu0 %v2206_v29  ;;  %p2430_p2 = por %p2429_p0, %p2428_p13 }
 0x5b6   : > { %1303 = vadd.xlane.f32.xlu1 %v1302_v23 }
 0x5b7   : > { %p2431_p3 = pnand %p2430_p2, %p2424_p1 }
 0x63f   : > { %v1301_v36 = vpop.xlane.xlu1 %1300 }
 0x640   : > { %v1305_v37 = vmul.f32 0.03125, %v1301_v36 }
 0x642   : > { %v1307_v39 = vmul.f32 %v1305_v37, %v1305_v37  ;;  %v1311_v43 = vsub.f32 %v1297_v21, %v1305_v37 }
 0x643   : > { %v1304_v38 = vpop.xlane.xlu1 %1303 }
 0x644   : > { %v1306_v40 = vmul.f32 0.03125, %v1304_v38 }
 0x646   : > { %v1308_v41 = vsub.f32 %v1306_v40, %v1307_v39 }
 0x648   : > { %v1309_v42 = vadd.f32 1e-05, %v1308_v41 }
 0x64a   : > { %2219 = vrsqrt.f32 %v1309_v42 }
 0x654   : > { %v2220_v44 = vpop.eup %2219 }
 0x655   : > { %v1312_v46 = vmul.f32 %v2220_v44, %v1311_v43 }
 0x657   : > { %v1319_v48 = vmul.f32 %v1833_v45, %v1312_v46 }
 0x659   : > { %v1326_v49 = vadd.f32 %v1834_v47, %v1319_v48 }
 0x65b   : > { %v1327_v50 = vpack.c.bf16 %v1326_v49, %v1326_v49 }
 0x65d   : > { %2028 = vmatmul.mubr.bf16.vlgmr.msra.gmra.mrb[12].mxu0 %v1327_v50 }
 0x730   : > { %v1433_v54 = vpop.f32.mrb[12].mxu0 }
 0x731   : > { %v1434_v55 = vadd.f32 %v1835_v53, %v1433_v54  ;;  %v2029_v56 = vpop.f32.mrb[13].mxu0 }
 0x732   : > { %v1436_v57 = vpop.f32.mrb[14].mxu0 }
 0x733   : > { %v1439_v58 = vmax.f32 %v1434_v55, 0.0  ;;  %v2030_v59 = vpop.f32.mrb[15].mxu0 }
 0x735   : > { %v1440_v60 = vpack.c.bf16 %v1439_v58, %v1439_v58 }
 0x737   : > { %2048 = vmatmul.mubr.bf16.vlgmr.msra.gmra.mrb[12].mxu1 %v1440_v60 }
 0x80a   : > { %v1546_v61 = vpop.f32.mrb[12].mxu1 }
 0x80b   : > { %v1547_v62 = vadd.f32 %v1844_v0, %v1546_v61  ;;  %v2049_v63 = vpop.f32.mrb[13].mxu1 }
 0x80c   : > { %v1549_v1 = vpop.f32.mrb[14].mxu1 }
 0x80d   : > { %v1552_v2 = vadd.f32 %v1547_v62, %v1326_v49  ;;  %v2050_v3 = vpop.f32.mrb[15].mxu1 }
 0x80f   : > { %1555 = vadd.xlane.f32.xlu0 %v1552_v2  ;;  %v1557_v4 = vmul.f32 %v1552_v2, %v1552_v2 }
 0x811   : > { %1558 = vadd.xlane.f32.xlu1 %v1557_v4 }
 0x812   : > { %2434 = shalt.err (!%p2431_p3)
}
 0x813   : > { %s2435_s23 = scalar_lea.hbm %s3054_s24, 64  ;;  %s2439_s16 = scalar_lea.hbm %s3205_s29, 128 }
 0x814   : > { %p2436_p4 = scmp.ne.s32.totalorder %s3054_s24, %s2435_s23  ;;  %p2440_p8 = scmp.lt.u32.totalorder %s3054_s24, %s3205_s29 }
 0x815   : > { %p2441_p5 = scmp.lt.u32.totalorder %s2439_s16, %s2435_s23  ;;  %p2443_p6 = scmp.lt.u32.totalorder %s2435_s23, %s3054_s24 }
 0x816   : > { %p2437_p10 = pnand %p2436_p4, %p3206_p9 }
 0x817   : > { %p2442_p7 = por %p2441_p5, %p2440_p8 }
 0x818   : > { %p2438_p11 = pneg %p2437_p10 }
 0x819   : > { %p2444_p12 = por %p2443_p6, %p2442_p7 }
 0x81b   : > { %p2445_p1 = pnand %p2444_p12, %p2438_p11 }
 0x81d   : > { %2448 = shalt.err (!%p2445_p1)
}
 0x81e   : > { %2078 = dma.vmem_to_hbm [thread:$0]  (%p3206_p9), %s1617_s27, 64, %s3054_s24, %s1590_s4  }
 0x81f   : > { %s3207_s19 = sld [smem:[#allocation34_spill]]  ;;  %s3208_s27 = sld [smem:[#allocation35_spill]] }
 0x820   : > { %s735_s4 = scalar_lea.vmem [#allocation14], %s1794_s21  ;;  %s3209_s25 = sshll.u32 %s2672_s2, 6 }
 0x821   : > { %s1603_s26 = sshll.u32 %s735_s4, 4  ;;  %s3210_s6 = sld [smem:[#allocation36_spill]]  ;;  %s3090_s26 = int_to_ptr.vmem [resolvable:$true] %s1603_s26 }
 0x822   : > { %s1585_s14 = scalar_lea.sflag [#allocation4], %s2921_s7  ;;  %s2449_s5 = scalar_lea.vmem %s3090_s26, 64 }
 0x823   : > { %p2450_p13 = scmp.ne.s32.totalorder %s3090_s26, %s2449_s5  ;;  %s2545_s21 = smov [#allocation14]  }
 0x825   : > { %v1853_v14 = vld [vmem:[%s3207_s19] ss:$0 sm:$0xff]  ;;  %p2451_p0 = pnand %p2450_p13, %p3206_p9  ;;  %s2453_s19 = sshll.u32 %s2545_s21, 4  ;;  %s2454_s19 = int_to_ptr.vmem [resolvable:$false] %s2453_s19 }
 0x826   : > { %v1854_v17 = vld [vmem:[%s3208_s27] ss:$0 sm:$0xff]  ;;  %s2455_s2 = scalar_lea.vmem %s2454_s19, 128  ;;  %p2456_p3 = scmp.lt.s32.totalorder %s3090_s26, %s2454_s19 }
 0x827   : > { %s3088_s8 = scalar_lea.hbm %s3210_s6, %s3209_s25  ;;  %p2452_p2 = pneg %p2451_p0 }
 0x828   : > { %p2457_p4 = scmp.lt.s32.totalorder %s2455_s2, %s2449_s5 }
 0x82a   : > { %p2458_p10 = por %p2457_p4, %p2456_p3 }
 0x82c   : > { %p2459_p11 = pnand %p2458_p10, %p2452_p2 }
 0x89c   : > { %v1556_v5 = vpop.xlane.xlu0 %1555 }
 0x89d   : > { %v1560_v6 = vmul.f32 0.03125, %v1556_v5 }
 0x89e   : > { %v1559_v7 = vpop.xlane.xlu1 %1558 }
 0x89f   : > { %v1562_v8 = vmul.f32 %v1560_v6, %v1560_v6  ;;  %v1561_v9 = vmul.f32 0.03125, %v1559_v7  ;;  %v1566_v12 = vsub.f32 %v1552_v2, %v1560_v6 }
 0x8a1   : > { %v1563_v10 = vsub.f32 %v1561_v9, %v1562_v8 }
 0x8a3   : > { %v1564_v11 = vadd.f32 1e-05, %v1563_v10 }
 0x8a5   : > { %2221 = vrsqrt.f32 %v1564_v11 }
 0x8af   : > { %v2222_v13 = vpop.eup %2221 }
 0x8b0   : > { %v1567_v15 = vmul.f32 %v2222_v13, %v1566_v12 }
 0x8b2   : > { %v1574_v18 = vmul.f32 %v1853_v14, %v1567_v15 }
 0x8b4   : > { %v1581_v19 = vadd.f32 %v1854_v17, %v1574_v18 }
 0x8b6   : > { %v1582_v20 = vpack.c.bf16 %v1581_v19, %v1581_v19 }
 0x8b8   : > { %1583 = vst [vmem:[%s735_s4] sm:$0xf] %v1582_v20 }
 0x8b9   : > { %2462 = shalt.err (!%p2459_p11)
}
 0x8ba   : > { %s2463_s7 = scalar_lea.hbm %s3088_s8, 64  ;;  %s2467_s27 = scalar_lea.hbm %s3210_s6, 128 }
 0x8bb   : > { %p2464_p8 = scmp.ne.s32.totalorder %s3088_s8, %s2463_s7  ;;  %p2468_p6 = scmp.lt.u32.totalorder %s3088_s8, %s3210_s6 }
 0x8bc   : > { %p2469_p12 = scmp.lt.u32.totalorder %s2467_s27, %s2463_s7  ;;  %p2471_p13 = scmp.lt.u32.totalorder %s2463_s7, %s3088_s8 }
 0x8bd   : > { %p2465_p5 = pnand %p2464_p8, %p3206_p9 }
 0x8be   : > { %p2470_p1 = por %p2469_p12, %p2468_p6 }
 0x8bf   : > { %p2466_p7 = pneg %p2465_p5 }
 0x8c0   : > { %p2472_p0 = por %p2471_p13, %p2470_p1 }
 0x8c2   : > { %p2473_p2 = pnand %p2472_p0, %p2466_p7 }
 0x8c4   : > { %2476 = shalt.err (!%p2473_p2)
}
 0x8c5   : > { %2077 = dma.vmem_to_hbm [thread:$0]  (%p3206_p9), %s3090_s26, 64, %s3088_s8, %s1585_s14  }
 0x8c6 PF: > { %s1628_s16 = sand.u32 1, %s2519_s1   ;;  %p3211_p3 = scmp.ne.s32.totalorder %s3189_s20, 0 }
 0x8c7   : > { %p3212_p4 = scmp.ge.s32.totalorder %s2531_s22, 2  ;;  %s1629_s15 = scalar_lea.sflag [#allocation4], %s1628_s16 }
 0x8c9   : > { %p2105_p10 = pnand %p3212_p4, %p3211_p3 }
 0x8cb   : > { %2510 = dma.done.wait (!%p2105_p10), %s1629_s15, 64  }
 0x8cc   : > { %2512 = vsyncadd (!%p2105_p10), %s1629_s15, 4294967232  ;;  %s1638_s5 = scalar_lea.sflag [#allocation16], %s1628_s16 }
 0x8cd   : > { %2514 = dma.done.wait (!%p2105_p10), %s1638_s5, 64  }
 0x8ce   : > { %2516 = vsyncadd (!%p2105_p10), %s1638_s5, 4294967232  ;;  %p40_p9 = scmp.ge.s32.totalorder %s2845_s3, 4   ;;  %s3213_s1 = smov %s2523_s17 }
 0x8cf   : > { %s3214_s17 = smov %s2527_s18  ;;  %s3215_s18 = smov %s2856_s12 }
 0x8d0   : > { %s3216_s22 = smov %s2845_s3  ;;  %42 = sbr.rel (!%p40_p9) target bundleno = 26 (0x1a), region = 182 }
 0x8d7   :  { %1643 = vsyncpa [#allocation3], 1 }
 0x8d8   :  { %1645 = vsyncpa [#allocation3 + $0x1], 1 }
 0x8d9   :  { %1646 = vsyncpa [#allocation6], 1 }
 0x8da   :  { %1647 = vsyncpa [#allocation9], 1 }
 0x8db   :  { %1648 = vsyncpa [#allocation12], 1 }
 0x8dc   :  { %1649 = vsyncpa [#allocation4], 1 }
 0x8dd   :  { %1651 = vsyncpa [#allocation4 + $0x1], 1 }
 0x8de   :  { %1652 = vsyncpa [#allocation16], 1 }
 0x8df   :  { %1654 = vsyncpa [#allocation16 + $0x1], 1 }

</bundles_post_ra>
